<compile_context>
chip_gen: v6e
topology: v6e:2x2x1
jax: 0.10.0
libtpu: 0.0.40
codegen_flags: <defaults>
</compile_context>

<pallas_src>
import math
from functools import partial

import numpy as np
import jax
import jax.numpy as jnp
from jax.experimental import pallas as pl
from jax.experimental.pallas import tpu as pltpu


# ----------------------------- kernel ---------------------------------------


def _layernorm(y, w, b, eps):
    mu = jnp.mean(y, axis=-1, keepdims=True)
    var = jnp.mean((y - mu) ** 2, axis=-1, keepdims=True)
    return (y - mu) * jax.lax.rsqrt(var + eps) * w + b


def user_embedding_kernel(
        src_ref, pe_ref, mask_ref,
        wqkv_ref, bqkv_ref, wo_ref, bo_ref,
        w1_ref, b1_ref, w2_ref, b2_ref,
        n1w_ref, n1b_ref, n2w_ref, n2b_ref,
        o_ref, *, nlayers, nhead, batch, pe_scale, eps):
    """Fused positional encoding + nlayers TransformerEncoder layers.

    src_ref / o_ref blocks: (S, B, E).  pe_ref block: (S, 1, E).
    Weights are stacked over layers: e.g. wqkv_ref: (L, E, 3E) (pre-transposed,
    Q part pre-scaled by 1/sqrt(head_dim)).
    """
    f32 = jnp.float32
    S = mask_ref.shape[0]
    E = pe_ref.shape[-1]
    dh = E // nhead
    B = batch

    pe = pe_ref[:, 0, :]                                    # (S, E)
    # Fold batch into the matmul M dimension: build a (B*S, E) activation slab
    # while applying  x = src * sqrt(E) + pe  (dropout = identity, eval mode).
    x = jnp.concatenate(
        [src_ref[:, b, :] * pe_scale + pe for b in range(B)], axis=0)
    mask = mask_ref[...]                                    # (S, S) additive

    for l in range(nlayers):                                # static layer loop
        # ---- packed, pre-transposed QKV projection: one (B*S,E)@(E,3E) ----
        qkv = jnp.dot(x, wqkv_ref[l], preferred_element_type=f32) + bqkv_ref[l]

        # ---- attention scores/softmax/context per (batch, head) ----
        # (1/sqrt(dh) already folded into the Q weights/bias at init)
        ctx_rows = []
        for b in range(B):
            r = b * S
            heads = []
            for h in range(nhead):
                c = h * dh
                qh = qkv[r:r + S, c:c + dh]
                kh = qkv[r:r + S, E + c:E + c + dh]
                vh = qkv[r:r + S, 2 * E + c:2 * E + c + dh]
                s = jax.lax.dot_general(
                    qh, kh, (((1,), (1,)), ((), ())),
                    preferred_element_type=f32) + mask      # (S, S)
                m = jnp.max(s, axis=-1, keepdims=True)
                p = jnp.exp(s - m)
                a = p * pl.reciprocal(jnp.sum(p, axis=-1, keepdims=True),
                                      approx=True)
                heads.append(jnp.dot(a, vh, preferred_element_type=f32))
            ctx_rows.append(jnp.concatenate(heads, axis=-1))  # (S, E)
        ctx = jnp.concatenate(ctx_rows, axis=0)               # (B*S, E)

        # ---- single output projection for all heads and batches ----
        attn = jnp.dot(ctx, wo_ref[l], preferred_element_type=f32) + bo_ref[l]

        # ---- residual + LayerNorm 1 ----
        y = _layernorm(x + attn, n1w_ref[l], n1b_ref[l], eps)

        # ---- feed-forward (relu) ----
        h1 = jnp.maximum(
            jnp.dot(y, w1_ref[l], preferred_element_type=f32) + b1_ref[l], 0.0)
        ff = jnp.dot(h1, w2_ref[l], preferred_element_type=f32) + b2_ref[l]

        # ---- residual + LayerNorm 2 ----
        x = _layernorm(y + ff, n2w_ref[l], n2b_ref[l], eps)

    # write back in (S, B, E) layout
    for b in range(B):
        o_ref[:, b, :] = x[b * S:(b + 1) * S, :].astype(o_ref.dtype)


# ----------------------------- wrapper ---------------------------------------


WEIGHT_NAMES = ('w_qkv', 'b_qkv', 'w_o', 'b_o', 'w1', 'b1', 'w2', 'b2',
                'n1w', 'n1b', 'n2w', 'n2b')


def user_embedding_forward(src, src_mask, params, *, embed_size, nhead, nlayers):
    """src: (S, B, E) float32 (PyTorch seq-first layout); src_mask: (S, S)."""
    S, B, E = src.shape
    assert E == embed_size
    weights = [params[n] for n in WEIGHT_NAMES]   # all stacked, 3-D

    full3 = lambda i: (0, 0, 0)
    in_specs = ([pl.BlockSpec((S, B, E), full3),          # src: whole tensor
                 pl.BlockSpec((S, 1, E), full3),          # pe: first S rows
                 pl.BlockSpec((S, S), lambda i: (0, 0))]  # additive mask
                + [pl.BlockSpec(w.shape, full3) for w in weights])

    out = pl.pallas_call(
        partial(user_embedding_kernel, nlayers=nlayers, nhead=nhead, batch=B,
                pe_scale=math.sqrt(embed_size), eps=1e-5),
        grid=(1,),
        in_specs=in_specs,
        out_specs=pl.BlockSpec((S, B, E), full3),
        out_shape=jax.ShapeDtypeStruct((S, B, E), jnp.float32),
        compiler_params=pltpu.CompilerParams(
            dimension_semantics=("arbitrary",)),
    )(src, params['pe'], src_mask, *weights)

    # torch's x.squeeze(0): only drops dim 0 if it is size 1
    return out[0] if out.shape[0] == 1 else out


# --------------------------- parameter setup ---------------------------------


def make_positional_encoding(d_model, max_len=500):
    position = np.arange(max_len, dtype=np.float32)[:, None]
    div_term = np.exp(np.arange(0, d_model, 2).astype(np.float32)
                      * (-math.log(10000.0) / d_model))
    pe = np.zeros((max_len, d_model), dtype=np.float32)
    pe[:, 0::2] = np.sin(position * div_term)
    pe[:, 1::2] = np.cos(position * div_term)
    return jnp.asarray(pe[:, None, :])                 # (max_len, 1, d_model)


def generate_square_subsequent_mask(sz):
    i = jnp.arange(sz)[:, None]
    j = jnp.arange(sz)[None, :]
    return jnp.where(j <= i, 0.0, -jnp.inf).astype(jnp.float32)


def init_params(key, embed_size, nhead, nhid, nlayers, max_len=500):
    """Weights stored pre-transposed (W.T) and Q/K/V packed, stacked over layers."""
    E, H = embed_size, nhid
    dh = E // nhead
    attn_scale = 1.0 / math.sqrt(dh)     # folded into the Q projection
    s_e = 1.0 / math.sqrt(E)
    s_h = 1.0 / math.sqrt(H)

    lists = {n: [] for n in WEIGHT_NAMES}
    for _ in range(nlayers):
        key, kq, kk, kv, ko, k1, k2 = jax.random.split(key, 7)
        wq = jax.random.normal(kq, (E, E), jnp.float32) * s_e   # torch (out,in)
        wk = jax.random.normal(kk, (E, E), jnp.float32) * s_e
        wv = jax.random.normal(kv, (E, E), jnp.float32) * s_e
        bq = jnp.zeros((E,), jnp.float32)
        bk = jnp.zeros((E,), jnp.float32)
        bv = jnp.zeros((E,), jnp.float32)
        lists['w_qkv'].append(
            jnp.concatenate([wq.T * attn_scale, wk.T, wv.T], axis=1))  # (E,3E)
        lists['b_qkv'].append(
            jnp.concatenate([bq * attn_scale, bk, bv], axis=0)[None, :])

        wo = jax.random.normal(ko, (E, E), jnp.float32) * s_e
        lists['w_o'].append(wo.T)
        lists['b_o'].append(jnp.zeros((1, E), jnp.float32))

        w1 = jax.random.normal(k1, (H, E), jnp.float32) * s_e
        lists['w1'].append(w1.T)                                       # (E,H)
        lists['b1'].append(jnp.zeros((1, H), jnp.float32))
        w2 = jax.random.normal(k2, (E, H), jnp.float32) * s_h
        lists['w2'].append(w2.T)                                       # (H,E)
        lists['b2'].append(jnp.zeros((1, E), jnp.float32))

        lists['n1w'].append(jnp.ones((1, E), jnp.float32))
        lists['n1b'].append(jnp.zeros((1, E), jnp.float32))
        lists['n2w'].append(jnp.ones((1, E), jnp.float32))
        lists['n2b'].append(jnp.zeros((1, E), jnp.float32))

    params = {n: jnp.stack(v, axis=0) for n, v in lists.items()}
    params['pe'] = make_positional_encoding(E, max_len)
    return params


# ------------------------------- main ----------------------------------------

if __name__ == "__main__":
    embed_size, nhead, nhid, nlayers = 32, 4, 64, 2
    S, B = 8, 2

    key = jax.random.PRNGKey(0)
    k_src, k_par = jax.random.split(key)
    src = jax.random.normal(k_src, (S, B, embed_size), jnp.float32)
    src_mask = generate_square_subsequent_mask(S)
    params = init_params(k_par, embed_size, nhead, nhid, nlayers)

    out = user_embedding_forward(src, src_mask, params,
                                 embed_size=embed_size, nhead=nhead,
                                 nlayers=nlayers)
    out = jax.block_until_ready(out)
    assert out.shape == (S, B, embed_size), out.shape
    assert bool(jnp.all(jnp.isfinite(out)))
    print("KERNEL_OK")
</pallas_src>

<mosaic_0001>
module attributes {stable_mosaic.version = 11 : i64} {
  func.func @user_embedding_kernel(%arg0: i32, %arg1: memref<8x2x32xf32, #tpu.memory_space<vmem>>, %arg2: memref<8x1x32xf32, #tpu.memory_space<vmem>>, %arg3: memref<8x8xf32, #tpu.memory_space<vmem>>, %arg4: memref<2x32x96xf32, #tpu.memory_space<vmem>>, %arg5: memref<2x1x96xf32, #tpu.memory_space<vmem>>, %arg6: memref<2x32x32xf32, #tpu.memory_space<vmem>>, %arg7: memref<2x1x32xf32, #tpu.memory_space<vmem>>, %arg8: memref<2x32x64xf32, #tpu.memory_space<vmem>>, %arg9: memref<2x1x64xf32, #tpu.memory_space<vmem>>, %arg10: memref<2x64x32xf32, #tpu.memory_space<vmem>>, %arg11: memref<2x1x32xf32, #tpu.memory_space<vmem>>, %arg12: memref<2x1x32xf32, #tpu.memory_space<vmem>>, %arg13: memref<2x1x32xf32, #tpu.memory_space<vmem>>, %arg14: memref<2x1x32xf32, #tpu.memory_space<vmem>>, %arg15: memref<2x1x32xf32, #tpu.memory_space<vmem>>, %arg16: memref<8x2x32xf32, #tpu.memory_space<vmem>>) attributes {dimension_semantics = [#tpu.dimension_semantics<arbitrary>], iteration_bounds = array<i64: 1>, scalar_prefetch = 0 : i64, scratch_operands = 0 : i64, tpu.core_type = #tpu.core_type<tc>, window_params = [{pipeline_mode = #tpu.pipeline_mode<synchronous>, transform_indices = @transform_0, window_bounds = array<i64: 8, 2, 32>}, {transform_indices = @transform_1, window_bounds = array<i64: 8, 1, 32>}, {pipeline_mode = #tpu.pipeline_mode<synchronous>, transform_indices = @transform_2, window_bounds = array<i64: 8, 8>}, {pipeline_mode = #tpu.pipeline_mode<synchronous>, transform_indices = @transform_3, window_bounds = array<i64: 2, 32, 96>}, {pipeline_mode = #tpu.pipeline_mode<synchronous>, transform_indices = @transform_4, window_bounds = array<i64: 2, 1, 96>}, {pipeline_mode = #tpu.pipeline_mode<synchronous>, transform_indices = @transform_5, window_bounds = array<i64: 2, 32, 32>}, {pipeline_mode = #tpu.pipeline_mode<synchronous>, transform_indices = @transform_6, window_bounds = array<i64: 2, 1, 32>}, {pipeline_mode = #tpu.pipeline_mode<synchronous>, transform_indices = @transform_7, window_bounds = array<i64: 2, 32, 64>}, {pipeline_mode = #tpu.pipeline_mode<synchronous>, transform_indices = @transform_8, window_bounds = array<i64: 2, 1, 64>}, {pipeline_mode = #tpu.pipeline_mode<synchronous>, transform_indices = @transform_9, window_bounds = array<i64: 2, 64, 32>}, {pipeline_mode = #tpu.pipeline_mode<synchronous>, transform_indices = @transform_10, window_bounds = array<i64: 2, 1, 32>}, {pipeline_mode = #tpu.pipeline_mode<synchronous>, transform_indices = @transform_11, window_bounds = array<i64: 2, 1, 32>}, {pipeline_mode = #tpu.pipeline_mode<synchronous>, transform_indices = @transform_12, window_bounds = array<i64: 2, 1, 32>}, {pipeline_mode = #tpu.pipeline_mode<synchronous>, transform_indices = @transform_13, window_bounds = array<i64: 2, 1, 32>}, {pipeline_mode = #tpu.pipeline_mode<synchronous>, transform_indices = @transform_14, window_bounds = array<i64: 2, 1, 32>}, {pipeline_mode = #tpu.pipeline_mode<synchronous>, transform_indices = @transform_15, window_bounds = array<i64: 8, 2, 32>}]} {
    %c0 = arith.constant 0 : index
    %c0_0 = arith.constant 0 : index
    %c0_1 = arith.constant 0 : index
    %0 = vector.load %arg2[%c0, %c0_0, %c0_1] : memref<8x1x32xf32, #tpu.memory_space<vmem>>, vector<8x1x32xf32>
    %1 = vector.shape_cast %0 : vector<8x1x32xf32> to vector<8x32xf32>
    %c0_2 = arith.constant 0 : index
    %c0_3 = arith.constant 0 : index
    %c0_4 = arith.constant 0 : index
    %2 = vector.load %arg1[%c0_2, %c0_3, %c0_4] : memref<8x2x32xf32, #tpu.memory_space<vmem>>, vector<8x1x32xf32>
    %3 = vector.shape_cast %2 : vector<8x1x32xf32> to vector<8x32xf32>
    %cst = arith.constant 5.65685415 : f32
    %4 = vector.broadcast %cst : f32 to vector<8x32xf32>
    %5 = arith.mulf %3, %4 : vector<8x32xf32>
    %6 = arith.addf %5, %1 : vector<8x32xf32>
    %c0_5 = arith.constant 0 : index
    %c1 = arith.constant 1 : index
    %c0_6 = arith.constant 0 : index
    %7 = vector.load %arg1[%c0_5, %c1, %c0_6] : memref<8x2x32xf32, #tpu.memory_space<vmem>>, vector<8x1x32xf32>
    %8 = vector.shape_cast %7 : vector<8x1x32xf32> to vector<8x32xf32>
    %cst_7 = arith.constant 5.65685415 : f32
    %9 = vector.broadcast %cst_7 : f32 to vector<8x32xf32>
    %10 = arith.mulf %8, %9 : vector<8x32xf32>
    %11 = arith.addf %10, %1 : vector<8x32xf32>
    %12 = tpu.concatenate %6, %11 in 0 : vector<8x32xf32>, vector<8x32xf32> -> vector<16x32xf32>
    %c0_8 = arith.constant 0 : index
    %c0_9 = arith.constant 0 : index
    %13 = vector.load %arg3[%c0_8, %c0_9] : memref<8x8xf32, #tpu.memory_space<vmem>>, vector<8x8xf32>
    %c0_10 = arith.constant 0 : index
    %c0_11 = arith.constant 0 : index
    %c0_12 = arith.constant 0 : index
    %14 = vector.load %arg4[%c0_10, %c0_11, %c0_12] : memref<2x32x96xf32, #tpu.memory_space<vmem>>, vector<1x32x96xf32>
    %15 = vector.shape_cast %14 : vector<1x32x96xf32> to vector<32x96xf32>
    %cst_13 = arith.constant dense<0.000000e+00> : vector<16x96xf32>
    %16 = tpu.matmul %12, %15, %cst_13 {dimension_numbers = #tpu.dot_dimension_numbers<[1], [0], [0], [1], [0, 0, 1, 1], [], []>} : vector<16x32xf32>, vector<32x96xf32>, vector<16x96xf32> -> vector<16x96xf32>
    %c0_14 = arith.constant 0 : index
    %c0_15 = arith.constant 0 : index
    %c0_16 = arith.constant 0 : index
    %17 = vector.load %arg5[%c0_14, %c0_15, %c0_16] : memref<2x1x96xf32, #tpu.memory_space<vmem>>, vector<1x1x96xf32>
    %18 = vector.shape_cast %17 : vector<1x1x96xf32> to vector<1x96xf32>
    %19 = vector.broadcast %18 : vector<1x96xf32> to vector<16x96xf32>
    %20 = arith.addf %16, %19 : vector<16x96xf32>
    %21 = vector.extract_strided_slice %20 {offsets = [0, 0], sizes = [8, 8], strides = [1, 1]} : vector<16x96xf32> to vector<8x8xf32>
    %22 = vector.extract_strided_slice %20 {offsets = [0, 32], sizes = [8, 8], strides = [1, 1]} : vector<16x96xf32> to vector<8x8xf32>
    %23 = vector.extract_strided_slice %20 {offsets = [0, 64], sizes = [8, 8], strides = [1, 1]} : vector<16x96xf32> to vector<8x8xf32>
    %cst_17 = arith.constant dense<0.000000e+00> : vector<8x8xf32>
    %24 = tpu.matmul %21, %22, %cst_17 {dimension_numbers = #tpu.dot_dimension_numbers<[1], [1], [0], [0], [0, 0, 1, 0], [], []>} : vector<8x8xf32>, vector<8x8xf32>, vector<8x8xf32> -> vector<8x8xf32>
    %25 = arith.addf %24, %13 : vector<8x8xf32>
    %cst_18 = arith.constant dense<0xFF800000> : vector<8xf32>
    %26 = vector.multi_reduction <maximumf>, %25, %cst_18 [1] : vector<8x8xf32> to vector<8xf32>
    %27 = vector.shape_cast %26 : vector<8xf32> to vector<8x1xf32>
    %28 = vector.broadcast %27 : vector<8x1xf32> to vector<8x8xf32>
    %29 = arith.subf %25, %28 : vector<8x8xf32>
    %30 = math.exp %29 : vector<8x8xf32>
    %cst_19 = arith.constant dense<0.000000e+00> : vector<8xf32>
    %31 = vector.multi_reduction <add>, %30, %cst_19 [1] : vector<8x8xf32> to vector<8xf32>
    %32 = vector.shape_cast %31 : vector<8xf32> to vector<8x1xf32>
    %33 = tpu.reciprocal %32 {approx = true} : vector<8x1xf32> -> vector<8x1xf32>
    %34 = vector.broadcast %33 : vector<8x1xf32> to vector<8x8xf32>
    %35 = arith.mulf %30, %34 : vector<8x8xf32>
    %cst_20 = arith.constant dense<0.000000e+00> : vector<8x8xf32>
    %36 = tpu.matmul %35, %23, %cst_20 {dimension_numbers = #tpu.dot_dimension_numbers<[1], [0], [0], [1], [0, 0, 1, 1], [], []>} : vector<8x8xf32>, vector<8x8xf32>, vector<8x8xf32> -> vector<8x8xf32>
    %37 = vector.extract_strided_slice %20 {offsets = [0, 8], sizes = [8, 8], strides = [1, 1]} : vector<16x96xf32> to vector<8x8xf32>
    %38 = vector.extract_strided_slice %20 {offsets = [0, 40], sizes = [8, 8], strides = [1, 1]} : vector<16x96xf32> to vector<8x8xf32>
    %39 = vector.extract_strided_slice %20 {offsets = [0, 72], sizes = [8, 8], strides = [1, 1]} : vector<16x96xf32> to vector<8x8xf32>
    %cst_21 = arith.constant dense<0.000000e+00> : vector<8x8xf32>
    %40 = tpu.matmul %37, %38, %cst_21 {dimension_numbers = #tpu.dot_dimension_numbers<[1], [1], [0], [0], [0, 0, 1, 0], [], []>} : vector<8x8xf32>, vector<8x8xf32>, vector<8x8xf32> -> vector<8x8xf32>
    %41 = arith.addf %40, %13 : vector<8x8xf32>
    %cst_22 = arith.constant dense<0xFF800000> : vector<8xf32>
    %42 = vector.multi_reduction <maximumf>, %41, %cst_22 [1] : vector<8x8xf32> to vector<8xf32>
    %43 = vector.shape_cast %42 : vector<8xf32> to vector<8x1xf32>
    %44 = vector.broadcast %43 : vector<8x1xf32> to vector<8x8xf32>
    %45 = arith.subf %41, %44 : vector<8x8xf32>
    %46 = math.exp %45 : vector<8x8xf32>
    %cst_23 = arith.constant dense<0.000000e+00> : vector<8xf32>
    %47 = vector.multi_reduction <add>, %46, %cst_23 [1] : vector<8x8xf32> to vector<8xf32>
    %48 = vector.shape_cast %47 : vector<8xf32> to vector<8x1xf32>
    %49 = tpu.reciprocal %48 {approx = true} : vector<8x1xf32> -> vector<8x1xf32>
    %50 = vector.broadcast %49 : vector<8x1xf32> to vector<8x8xf32>
    %51 = arith.mulf %46, %50 : vector<8x8xf32>
    %cst_24 = arith.constant dense<0.000000e+00> : vector<8x8xf32>
    %52 = tpu.matmul %51, %39, %cst_24 {dimension_numbers = #tpu.dot_dimension_numbers<[1], [0], [0], [1], [0, 0, 1, 1], [], []>} : vector<8x8xf32>, vector<8x8xf32>, vector<8x8xf32> -> vector<8x8xf32>
    %53 = vector.extract_strided_slice %20 {offsets = [0, 16], sizes = [8, 8], strides = [1, 1]} : vector<16x96xf32> to vector<8x8xf32>
    %54 = vector.extract_strided_slice %20 {offsets = [0, 48], sizes = [8, 8], strides = [1, 1]} : vector<16x96xf32> to vector<8x8xf32>
    %55 = vector.extract_strided_slice %20 {offsets = [0, 80], sizes = [8, 8], strides = [1, 1]} : vector<16x96xf32> to vector<8x8xf32>
    %cst_25 = arith.constant dense<0.000000e+00> : vector<8x8xf32>
    %56 = tpu.matmul %53, %54, %cst_25 {dimension_numbers = #tpu.dot_dimension_numbers<[1], [1], [0], [0], [0, 0, 1, 0], [], []>} : vector<8x8xf32>, vector<8x8xf32>, vector<8x8xf32> -> vector<8x8xf32>
    %57 = arith.addf %56, %13 : vector<8x8xf32>
    %cst_26 = arith.constant dense<0xFF800000> : vector<8xf32>
    %58 = vector.multi_reduction <maximumf>, %57, %cst_26 [1] : vector<8x8xf32> to vector<8xf32>
    %59 = vector.shape_cast %58 : vector<8xf32> to vector<8x1xf32>
    %60 = vector.broadcast %59 : vector<8x1xf32> to vector<8x8xf32>
    %61 = arith.subf %57, %60 : vector<8x8xf32>
    %62 = math.exp %61 : vector<8x8xf32>
    %cst_27 = arith.constant dense<0.000000e+00> : vector<8xf32>
    %63 = vector.multi_reduction <add>, %62, %cst_27 [1] : vector<8x8xf32> to vector<8xf32>
    %64 = vector.shape_cast %63 : vector<8xf32> to vector<8x1xf32>
    %65 = tpu.reciprocal %64 {approx = true} : vector<8x1xf32> -> vector<8x1xf32>
    %66 = vector.broadcast %65 : vector<8x1xf32> to vector<8x8xf32>
    %67 = arith.mulf %62, %66 : vector<8x8xf32>
    %cst_28 = arith.constant dense<0.000000e+00> : vector<8x8xf32>
    %68 = tpu.matmul %67, %55, %cst_28 {dimension_numbers = #tpu.dot_dimension_numbers<[1], [0], [0], [1], [0, 0, 1, 1], [], []>} : vector<8x8xf32>, vector<8x8xf32>, vector<8x8xf32> -> vector<8x8xf32>
    %69 = vector.extract_strided_slice %20 {offsets = [0, 24], sizes = [8, 8], strides = [1, 1]} : vector<16x96xf32> to vector<8x8xf32>
    %70 = vector.extract_strided_slice %20 {offsets = [0, 56], sizes = [8, 8], strides = [1, 1]} : vector<16x96xf32> to vector<8x8xf32>
    %71 = vector.extract_strided_slice %20 {offsets = [0, 88], sizes = [8, 8], strides = [1, 1]} : vector<16x96xf32> to vector<8x8xf32>
    %cst_29 = arith.constant dense<0.000000e+00> : vector<8x8xf32>
    %72 = tpu.matmul %69, %70, %cst_29 {dimension_numbers = #tpu.dot_dimension_numbers<[1], [1], [0], [0], [0, 0, 1, 0], [], []>} : vector<8x8xf32>, vector<8x8xf32>, vector<8x8xf32> -> vector<8x8xf32>
    %73 = arith.addf %72, %13 : vector<8x8xf32>
    %cst_30 = arith.constant dense<0xFF800000> : vector<8xf32>
    %74 = vector.multi_reduction <maximumf>, %73, %cst_30 [1] : vector<8x8xf32> to vector<8xf32>
    %75 = vector.shape_cast %74 : vector<8xf32> to vector<8x1xf32>
    %76 = vector.broadcast %75 : vector<8x1xf32> to vector<8x8xf32>
    %77 = arith.subf %73, %76 : vector<8x8xf32>
    %78 = math.exp %77 : vector<8x8xf32>
    %cst_31 = arith.constant dense<0.000000e+00> : vector<8xf32>
    %79 = vector.multi_reduction <add>, %78, %cst_31 [1] : vector<8x8xf32> to vector<8xf32>
    %80 = vector.shape_cast %79 : vector<8xf32> to vector<8x1xf32>
    %81 = tpu.reciprocal %80 {approx = true} : vector<8x1xf32> -> vector<8x1xf32>
    %82 = vector.broadcast %81 : vector<8x1xf32> to vector<8x8xf32>
    %83 = arith.mulf %78, %82 : vector<8x8xf32>
    %cst_32 = arith.constant dense<0.000000e+00> : vector<8x8xf32>
    %84 = tpu.matmul %83, %71, %cst_32 {dimension_numbers = #tpu.dot_dimension_numbers<[1], [0], [0], [1], [0, 0, 1, 1], [], []>} : vector<8x8xf32>, vector<8x8xf32>, vector<8x8xf32> -> vector<8x8xf32>
    %85 = tpu.concatenate %36, %52, %68, %84 in 1 : vector<8x8xf32>, vector<8x8xf32>, vector<8x8xf32>, vector<8x8xf32> -> vector<8x32xf32>
    %86 = vector.extract_strided_slice %20 {offsets = [8, 0], sizes = [8, 8], strides = [1, 1]} : vector<16x96xf32> to vector<8x8xf32>
    %87 = vector.extract_strided_slice %20 {offsets = [8, 32], sizes = [8, 8], strides = [1, 1]} : vector<16x96xf32> to vector<8x8xf32>
    %88 = vector.extract_strided_slice %20 {offsets = [8, 64], sizes = [8, 8], strides = [1, 1]} : vector<16x96xf32> to vector<8x8xf32>
    %cst_33 = arith.constant dense<0.000000e+00> : vector<8x8xf32>
    %89 = tpu.matmul %86, %87, %cst_33 {dimension_numbers = #tpu.dot_dimension_numbers<[1], [1], [0], [0], [0, 0, 1, 0], [], []>} : vector<8x8xf32>, vector<8x8xf32>, vector<8x8xf32> -> vector<8x8xf32>
    %90 = arith.addf %89, %13 : vector<8x8xf32>
    %cst_34 = arith.constant dense<0xFF800000> : vector<8xf32>
    %91 = vector.multi_reduction <maximumf>, %90, %cst_34 [1] : vector<8x8xf32> to vector<8xf32>
    %92 = vector.shape_cast %91 : vector<8xf32> to vector<8x1xf32>
    %93 = vector.broadcast %92 : vector<8x1xf32> to vector<8x8xf32>
    %94 = arith.subf %90, %93 : vector<8x8xf32>
    %95 = math.exp %94 : vector<8x8xf32>
    %cst_35 = arith.constant dense<0.000000e+00> : vector<8xf32>
    %96 = vector.multi_reduction <add>, %95, %cst_35 [1] : vector<8x8xf32> to vector<8xf32>
    %97 = vector.shape_cast %96 : vector<8xf32> to vector<8x1xf32>
    %98 = tpu.reciprocal %97 {approx = true} : vector<8x1xf32> -> vector<8x1xf32>
    %99 = vector.broadcast %98 : vector<8x1xf32> to vector<8x8xf32>
    %100 = arith.mulf %95, %99 : vector<8x8xf32>
    %cst_36 = arith.constant dense<0.000000e+00> : vector<8x8xf32>
    %101 = tpu.matmul %100, %88, %cst_36 {dimension_numbers = #tpu.dot_dimension_numbers<[1], [0], [0], [1], [0, 0, 1, 1], [], []>} : vector<8x8xf32>, vector<8x8xf32>, vector<8x8xf32> -> vector<8x8xf32>
    %102 = vector.extract_strided_slice %20 {offsets = [8, 8], sizes = [8, 8], strides = [1, 1]} : vector<16x96xf32> to vector<8x8xf32>
    %103 = vector.extract_strided_slice %20 {offsets = [8, 40], sizes = [8, 8], strides = [1, 1]} : vector<16x96xf32> to vector<8x8xf32>
    %104 = vector.extract_strided_slice %20 {offsets = [8, 72], sizes = [8, 8], strides = [1, 1]} : vector<16x96xf32> to vector<8x8xf32>
    %cst_37 = arith.constant dense<0.000000e+00> : vector<8x8xf32>
    %105 = tpu.matmul %102, %103, %cst_37 {dimension_numbers = #tpu.dot_dimension_numbers<[1], [1], [0], [0], [0, 0, 1, 0], [], []>} : vector<8x8xf32>, vector<8x8xf32>, vector<8x8xf32> -> vector<8x8xf32>
    %106 = arith.addf %105, %13 : vector<8x8xf32>
    %cst_38 = arith.constant dense<0xFF800000> : vector<8xf32>
    %107 = vector.multi_reduction <maximumf>, %106, %cst_38 [1] : vector<8x8xf32> to vector<8xf32>
    %108 = vector.shape_cast %107 : vector<8xf32> to vector<8x1xf32>
    %109 = vector.broadcast %108 : vector<8x1xf32> to vector<8x8xf32>
    %110 = arith.subf %106, %109 : vector<8x8xf32>
    %111 = math.exp %110 : vector<8x8xf32>
    %cst_39 = arith.constant dense<0.000000e+00> : vector<8xf32>
    %112 = vector.multi_reduction <add>, %111, %cst_39 [1] : vector<8x8xf32> to vector<8xf32>
    %113 = vector.shape_cast %112 : vector<8xf32> to vector<8x1xf32>
    %114 = tpu.reciprocal %113 {approx = true} : vector<8x1xf32> -> vector<8x1xf32>
    %115 = vector.broadcast %114 : vector<8x1xf32> to vector<8x8xf32>
    %116 = arith.mulf %111, %115 : vector<8x8xf32>
    %cst_40 = arith.constant dense<0.000000e+00> : vector<8x8xf32>
    %117 = tpu.matmul %116, %104, %cst_40 {dimension_numbers = #tpu.dot_dimension_numbers<[1], [0], [0], [1], [0, 0, 1, 1], [], []>} : vector<8x8xf32>, vector<8x8xf32>, vector<8x8xf32> -> vector<8x8xf32>
    %118 = vector.extract_strided_slice %20 {offsets = [8, 16], sizes = [8, 8], strides = [1, 1]} : vector<16x96xf32> to vector<8x8xf32>
    %119 = vector.extract_strided_slice %20 {offsets = [8, 48], sizes = [8, 8], strides = [1, 1]} : vector<16x96xf32> to vector<8x8xf32>
    %120 = vector.extract_strided_slice %20 {offsets = [8, 80], sizes = [8, 8], strides = [1, 1]} : vector<16x96xf32> to vector<8x8xf32>
    %cst_41 = arith.constant dense<0.000000e+00> : vector<8x8xf32>
    %121 = tpu.matmul %118, %119, %cst_41 {dimension_numbers = #tpu.dot_dimension_numbers<[1], [1], [0], [0], [0, 0, 1, 0], [], []>} : vector<8x8xf32>, vector<8x8xf32>, vector<8x8xf32> -> vector<8x8xf32>
    %122 = arith.addf %121, %13 : vector<8x8xf32>
    %cst_42 = arith.constant dense<0xFF800000> : vector<8xf32>
    %123 = vector.multi_reduction <maximumf>, %122, %cst_42 [1] : vector<8x8xf32> to vector<8xf32>
    %124 = vector.shape_cast %123 : vector<8xf32> to vector<8x1xf32>
    %125 = vector.broadcast %124 : vector<8x1xf32> to vector<8x8xf32>
    %126 = arith.subf %122, %125 : vector<8x8xf32>
    %127 = math.exp %126 : vector<8x8xf32>
    %cst_43 = arith.constant dense<0.000000e+00> : vector<8xf32>
    %128 = vector.multi_reduction <add>, %127, %cst_43 [1] : vector<8x8xf32> to vector<8xf32>
    %129 = vector.shape_cast %128 : vector<8xf32> to vector<8x1xf32>
    %130 = tpu.reciprocal %129 {approx = true} : vector<8x1xf32> -> vector<8x1xf32>
    %131 = vector.broadcast %130 : vector<8x1xf32> to vector<8x8xf32>
    %132 = arith.mulf %127, %131 : vector<8x8xf32>
    %cst_44 = arith.constant dense<0.000000e+00> : vector<8x8xf32>
    %133 = tpu.matmul %132, %120, %cst_44 {dimension_numbers = #tpu.dot_dimension_numbers<[1], [0], [0], [1], [0, 0, 1, 1], [], []>} : vector<8x8xf32>, vector<8x8xf32>, vector<8x8xf32> -> vector<8x8xf32>
    %134 = vector.extract_strided_slice %20 {offsets = [8, 24], sizes = [8, 8], strides = [1, 1]} : vector<16x96xf32> to vector<8x8xf32>
    %135 = vector.extract_strided_slice %20 {offsets = [8, 56], sizes = [8, 8], strides = [1, 1]} : vector<16x96xf32> to vector<8x8xf32>
    %136 = vector.extract_strided_slice %20 {offsets = [8, 88], sizes = [8, 8], strides = [1, 1]} : vector<16x96xf32> to vector<8x8xf32>
    %cst_45 = arith.constant dense<0.000000e+00> : vector<8x8xf32>
    %137 = tpu.matmul %134, %135, %cst_45 {dimension_numbers = #tpu.dot_dimension_numbers<[1], [1], [0], [0], [0, 0, 1, 0], [], []>} : vector<8x8xf32>, vector<8x8xf32>, vector<8x8xf32> -> vector<8x8xf32>
    %138 = arith.addf %137, %13 : vector<8x8xf32>
    %cst_46 = arith.constant dense<0xFF800000> : vector<8xf32>
    %139 = vector.multi_reduction <maximumf>, %138, %cst_46 [1] : vector<8x8xf32> to vector<8xf32>
    %140 = vector.shape_cast %139 : vector<8xf32> to vector<8x1xf32>
    %141 = vector.broadcast %140 : vector<8x1xf32> to vector<8x8xf32>
    %142 = arith.subf %138, %141 : vector<8x8xf32>
    %143 = math.exp %142 : vector<8x8xf32>
    %cst_47 = arith.constant dense<0.000000e+00> : vector<8xf32>
    %144 = vector.multi_reduction <add>, %143, %cst_47 [1] : vector<8x8xf32> to vector<8xf32>
    %145 = vector.shape_cast %144 : vector<8xf32> to vector<8x1xf32>
    %146 = tpu.reciprocal %145 {approx = true} : vector<8x1xf32> -> vector<8x1xf32>
    %147 = vector.broadcast %146 : vector<8x1xf32> to vector<8x8xf32>
    %148 = arith.mulf %143, %147 : vector<8x8xf32>
    %cst_48 = arith.constant dense<0.000000e+00> : vector<8x8xf32>
    %149 = tpu.matmul %148, %136, %cst_48 {dimension_numbers = #tpu.dot_dimension_numbers<[1], [0], [0], [1], [0, 0, 1, 1], [], []>} : vector<8x8xf32>, vector<8x8xf32>, vector<8x8xf32> -> vector<8x8xf32>
    %150 = tpu.concatenate %101, %117, %133, %149 in 1 : vector<8x8xf32>, vector<8x8xf32>, vector<8x8xf32>, vector<8x8xf32> -> vector<8x32xf32>
    %151 = tpu.concatenate %85, %150 in 0 : vector<8x32xf32>, vector<8x32xf32> -> vector<16x32xf32>
    %c0_49 = arith.constant 0 : index
    %c0_50 = arith.constant 0 : index
    %c0_51 = arith.constant 0 : index
    %152 = vector.load %arg6[%c0_49, %c0_50, %c0_51] : memref<2x32x32xf32, #tpu.memory_space<vmem>>, vector<1x32x32xf32>
    %153 = vector.shape_cast %152 : vector<1x32x32xf32> to vector<32x32xf32>
    %cst_52 = arith.constant dense<0.000000e+00> : vector<16x32xf32>
    %154 = tpu.matmul %151, %153, %cst_52 {dimension_numbers = #tpu.dot_dimension_numbers<[1], [0], [0], [1], [0, 0, 1, 1], [], []>} : vector<16x32xf32>, vector<32x32xf32>, vector<16x32xf32> -> vector<16x32xf32>
    %c0_53 = arith.constant 0 : index
    %c0_54 = arith.constant 0 : index
    %c0_55 = arith.constant 0 : index
    %155 = vector.load %arg7[%c0_53, %c0_54, %c0_55] : memref<2x1x32xf32, #tpu.memory_space<vmem>>, vector<1x1x32xf32>
    %156 = vector.shape_cast %155 : vector<1x1x32xf32> to vector<1x32xf32>
    %157 = vector.broadcast %156 : vector<1x32xf32> to vector<16x32xf32>
    %158 = arith.addf %154, %157 : vector<16x32xf32>
    %159 = arith.addf %12, %158 : vector<16x32xf32>
    %c0_56 = arith.constant 0 : index
    %c0_57 = arith.constant 0 : index
    %c0_58 = arith.constant 0 : index
    %160 = vector.load %arg12[%c0_56, %c0_57, %c0_58] : memref<2x1x32xf32, #tpu.memory_space<vmem>>, vector<1x1x32xf32>
    %161 = vector.shape_cast %160 : vector<1x1x32xf32> to vector<1x32xf32>
    %c0_59 = arith.constant 0 : index
    %c0_60 = arith.constant 0 : index
    %c0_61 = arith.constant 0 : index
    %162 = vector.load %arg13[%c0_59, %c0_60, %c0_61] : memref<2x1x32xf32, #tpu.memory_space<vmem>>, vector<1x1x32xf32>
    %163 = vector.shape_cast %162 : vector<1x1x32xf32> to vector<1x32xf32>
    %cst_62 = arith.constant dense<0.000000e+00> : vector<16xf32>
    %164 = vector.multi_reduction <add>, %159, %cst_62 [1] : vector<16x32xf32> to vector<16xf32>
    %165 = vector.shape_cast %164 : vector<16xf32> to vector<16x1xf32>
    %cst_63 = arith.constant 3.200000e+01 : f32
    %166 = vector.broadcast %cst_63 : f32 to vector<16x1xf32>
    %167 = arith.divf %165, %166 : vector<16x1xf32>
    %168 = vector.broadcast %167 : vector<16x1xf32> to vector<16x32xf32>
    %169 = arith.subf %159, %168 : vector<16x32xf32>
    %170 = arith.mulf %169, %169 : vector<16x32xf32>
    %cst_64 = arith.constant dense<0.000000e+00> : vector<16xf32>
    %171 = vector.multi_reduction <add>, %170, %cst_64 [1] : vector<16x32xf32> to vector<16xf32>
    %172 = vector.shape_cast %171 : vector<16xf32> to vector<16x1xf32>
    %cst_65 = arith.constant 3.200000e+01 : f32
    %173 = vector.broadcast %cst_65 : f32 to vector<16x1xf32>
    %174 = arith.divf %172, %173 : vector<16x1xf32>
    %175 = vector.broadcast %167 : vector<16x1xf32> to vector<16x32xf32>
    %176 = arith.subf %159, %175 : vector<16x32xf32>
    %cst_66 = arith.constant 9.99999974E-6 : f32
    %177 = vector.broadcast %cst_66 : f32 to vector<16x1xf32>
    %178 = arith.addf %174, %177 : vector<16x1xf32>
    %179 = math.rsqrt %178 : vector<16x1xf32>
    %180 = vector.broadcast %179 : vector<16x1xf32> to vector<16x32xf32>
    %181 = arith.mulf %176, %180 : vector<16x32xf32>
    %182 = vector.broadcast %161 : vector<1x32xf32> to vector<16x32xf32>
    %183 = arith.mulf %181, %182 : vector<16x32xf32>
    %184 = vector.broadcast %163 : vector<1x32xf32> to vector<16x32xf32>
    %185 = arith.addf %183, %184 : vector<16x32xf32>
    %c0_67 = arith.constant 0 : index
    %c0_68 = arith.constant 0 : index
    %c0_69 = arith.constant 0 : index
    %186 = vector.load %arg8[%c0_67, %c0_68, %c0_69] : memref<2x32x64xf32, #tpu.memory_space<vmem>>, vector<1x32x64xf32>
    %187 = vector.shape_cast %186 : vector<1x32x64xf32> to vector<32x64xf32>
    %cst_70 = arith.constant dense<0.000000e+00> : vector<16x64xf32>
    %188 = tpu.matmul %185, %187, %cst_70 {dimension_numbers = #tpu.dot_dimension_numbers<[1], [0], [0], [1], [0, 0, 1, 1], [], []>} : vector<16x32xf32>, vector<32x64xf32>, vector<16x64xf32> -> vector<16x64xf32>
    %c0_71 = arith.constant 0 : index
    %c0_72 = arith.constant 0 : index
    %c0_73 = arith.constant 0 : index
    %189 = vector.load %arg9[%c0_71, %c0_72, %c0_73] : memref<2x1x64xf32, #tpu.memory_space<vmem>>, vector<1x1x64xf32>
    %190 = vector.shape_cast %189 : vector<1x1x64xf32> to vector<1x64xf32>
    %191 = vector.broadcast %190 : vector<1x64xf32> to vector<16x64xf32>
    %192 = arith.addf %188, %191 : vector<16x64xf32>
    %cst_74 = arith.constant 0.000000e+00 : f32
    %193 = vector.broadcast %cst_74 : f32 to vector<16x64xf32>
    %194 = arith.maximumf %192, %193 : vector<16x64xf32>
    %c0_75 = arith.constant 0 : index
    %c0_76 = arith.constant 0 : index
    %c0_77 = arith.constant 0 : index
    %195 = vector.load %arg10[%c0_75, %c0_76, %c0_77] : memref<2x64x32xf32, #tpu.memory_space<vmem>>, vector<1x64x32xf32>
    %196 = vector.shape_cast %195 : vector<1x64x32xf32> to vector<64x32xf32>
    %cst_78 = arith.constant dense<0.000000e+00> : vector<16x32xf32>
    %197 = tpu.matmul %194, %196, %cst_78 {dimension_numbers = #tpu.dot_dimension_numbers<[1], [0], [0], [1], [0, 0, 1, 1], [], []>} : vector<16x64xf32>, vector<64x32xf32>, vector<16x32xf32> -> vector<16x32xf32>
    %c0_79 = arith.constant 0 : index
    %c0_80 = arith.constant 0 : index
    %c0_81 = arith.constant 0 : index
    %198 = vector.load %arg11[%c0_79, %c0_80, %c0_81] : memref<2x1x32xf32, #tpu.memory_space<vmem>>, vector<1x1x32xf32>
    %199 = vector.shape_cast %198 : vector<1x1x32xf32> to vector<1x32xf32>
    %200 = vector.broadcast %199 : vector<1x32xf32> to vector<16x32xf32>
    %201 = arith.addf %197, %200 : vector<16x32xf32>
    %202 = arith.addf %185, %201 : vector<16x32xf32>
    %c0_82 = arith.constant 0 : index
    %c0_83 = arith.constant 0 : index
    %c0_84 = arith.constant 0 : index
    %203 = vector.load %arg14[%c0_82, %c0_83, %c0_84] : memref<2x1x32xf32, #tpu.memory_space<vmem>>, vector<1x1x32xf32>
    %204 = vector.shape_cast %203 : vector<1x1x32xf32> to vector<1x32xf32>
    %c0_85 = arith.constant 0 : index
    %c0_86 = arith.constant 0 : index
    %c0_87 = arith.constant 0 : index
    %205 = vector.load %arg15[%c0_85, %c0_86, %c0_87] : memref<2x1x32xf32, #tpu.memory_space<vmem>>, vector<1x1x32xf32>
    %206 = vector.shape_cast %205 : vector<1x1x32xf32> to vector<1x32xf32>
    %cst_88 = arith.constant dense<0.000000e+00> : vector<16xf32>
    %207 = vector.multi_reduction <add>, %202, %cst_88 [1] : vector<16x32xf32> to vector<16xf32>
    %208 = vector.shape_cast %207 : vector<16xf32> to vector<16x1xf32>
    %cst_89 = arith.constant 3.200000e+01 : f32
    %209 = vector.broadcast %cst_89 : f32 to vector<16x1xf32>
    %210 = arith.divf %208, %209 : vector<16x1xf32>
    %211 = vector.broadcast %210 : vector<16x1xf32> to vector<16x32xf32>
    %212 = arith.subf %202, %211 : vector<16x32xf32>
    %213 = arith.mulf %212, %212 : vector<16x32xf32>
    %cst_90 = arith.constant dense<0.000000e+00> : vector<16xf32>
    %214 = vector.multi_reduction <add>, %213, %cst_90 [1] : vector<16x32xf32> to vector<16xf32>
    %215 = vector.shape_cast %214 : vector<16xf32> to vector<16x1xf32>
    %cst_91 = arith.constant 3.200000e+01 : f32
    %216 = vector.broadcast %cst_91 : f32 to vector<16x1xf32>
    %217 = arith.divf %215, %216 : vector<16x1xf32>
    %218 = vector.broadcast %210 : vector<16x1xf32> to vector<16x32xf32>
    %219 = arith.subf %202, %218 : vector<16x32xf32>
    %cst_92 = arith.constant 9.99999974E-6 : f32
    %220 = vector.broadcast %cst_92 : f32 to vector<16x1xf32>
    %221 = arith.addf %217, %220 : vector<16x1xf32>
    %222 = math.rsqrt %221 : vector<16x1xf32>
    %223 = vector.broadcast %222 : vector<16x1xf32> to vector<16x32xf32>
    %224 = arith.mulf %219, %223 : vector<16x32xf32>
    %225 = vector.broadcast %204 : vector<1x32xf32> to vector<16x32xf32>
    %226 = arith.mulf %224, %225 : vector<16x32xf32>
    %227 = vector.broadcast %206 : vector<1x32xf32> to vector<16x32xf32>
    %228 = arith.addf %226, %227 : vector<16x32xf32>
    %c1_93 = arith.constant 1 : index
    %c0_94 = arith.constant 0 : index
    %c0_95 = arith.constant 0 : index
    %229 = vector.load %arg4[%c1_93, %c0_94, %c0_95] : memref<2x32x96xf32, #tpu.memory_space<vmem>>, vector<1x32x96xf32>
    %230 = vector.shape_cast %229 : vector<1x32x96xf32> to vector<32x96xf32>
    %cst_96 = arith.constant dense<0.000000e+00> : vector<16x96xf32>
    %231 = tpu.matmul %228, %230, %cst_96 {dimension_numbers = #tpu.dot_dimension_numbers<[1], [0], [0], [1], [0, 0, 1, 1], [], []>} : vector<16x32xf32>, vector<32x96xf32>, vector<16x96xf32> -> vector<16x96xf32>
    %c1_97 = arith.constant 1 : index
    %c0_98 = arith.constant 0 : index
    %c0_99 = arith.constant 0 : index
    %232 = vector.load %arg5[%c1_97, %c0_98, %c0_99] : memref<2x1x96xf32, #tpu.memory_space<vmem>>, vector<1x1x96xf32>
    %233 = vector.shape_cast %232 : vector<1x1x96xf32> to vector<1x96xf32>
    %234 = vector.broadcast %233 : vector<1x96xf32> to vector<16x96xf32>
    %235 = arith.addf %231, %234 : vector<16x96xf32>
    %236 = vector.extract_strided_slice %235 {offsets = [0, 0], sizes = [8, 8], strides = [1, 1]} : vector<16x96xf32> to vector<8x8xf32>
    %237 = vector.extract_strided_slice %235 {offsets = [0, 32], sizes = [8, 8], strides = [1, 1]} : vector<16x96xf32> to vector<8x8xf32>
    %238 = vector.extract_strided_slice %235 {offsets = [0, 64], sizes = [8, 8], strides = [1, 1]} : vector<16x96xf32> to vector<8x8xf32>
    %cst_100 = arith.constant dense<0.000000e+00> : vector<8x8xf32>
    %239 = tpu.matmul %236, %237, %cst_100 {dimension_numbers = #tpu.dot_dimension_numbers<[1], [1], [0], [0], [0, 0, 1, 0], [], []>} : vector<8x8xf32>, vector<8x8xf32>, vector<8x8xf32> -> vector<8x8xf32>
    %240 = arith.addf %239, %13 : vector<8x8xf32>
    %cst_101 = arith.constant dense<0xFF800000> : vector<8xf32>
    %241 = vector.multi_reduction <maximumf>, %240, %cst_101 [1] : vector<8x8xf32> to vector<8xf32>
    %242 = vector.shape_cast %241 : vector<8xf32> to vector<8x1xf32>
    %243 = vector.broadcast %242 : vector<8x1xf32> to vector<8x8xf32>
    %244 = arith.subf %240, %243 : vector<8x8xf32>
    %245 = math.exp %244 : vector<8x8xf32>
    %cst_102 = arith.constant dense<0.000000e+00> : vector<8xf32>
    %246 = vector.multi_reduction <add>, %245, %cst_102 [1] : vector<8x8xf32> to vector<8xf32>
    %247 = vector.shape_cast %246 : vector<8xf32> to vector<8x1xf32>
    %248 = tpu.reciprocal %247 {approx = true} : vector<8x1xf32> -> vector<8x1xf32>
    %249 = vector.broadcast %248 : vector<8x1xf32> to vector<8x8xf32>
    %250 = arith.mulf %245, %249 : vector<8x8xf32>
    %cst_103 = arith.constant dense<0.000000e+00> : vector<8x8xf32>
    %251 = tpu.matmul %250, %238, %cst_103 {dimension_numbers = #tpu.dot_dimension_numbers<[1], [0], [0], [1], [0, 0, 1, 1], [], []>} : vector<8x8xf32>, vector<8x8xf32>, vector<8x8xf32> -> vector<8x8xf32>
    %252 = vector.extract_strided_slice %235 {offsets = [0, 8], sizes = [8, 8], strides = [1, 1]} : vector<16x96xf32> to vector<8x8xf32>
    %253 = vector.extract_strided_slice %235 {offsets = [0, 40], sizes = [8, 8], strides = [1, 1]} : vector<16x96xf32> to vector<8x8xf32>
    %254 = vector.extract_strided_slice %235 {offsets = [0, 72], sizes = [8, 8], strides = [1, 1]} : vector<16x96xf32> to vector<8x8xf32>
    %cst_104 = arith.constant dense<0.000000e+00> : vector<8x8xf32>
    %255 = tpu.matmul %252, %253, %cst_104 {dimension_numbers = #tpu.dot_dimension_numbers<[1], [1], [0], [0], [0, 0, 1, 0], [], []>} : vector<8x8xf32>, vector<8x8xf32>, vector<8x8xf32> -> vector<8x8xf32>
    %256 = arith.addf %255, %13 : vector<8x8xf32>
    %cst_105 = arith.constant dense<0xFF800000> : vector<8xf32>
    %257 = vector.multi_reduction <maximumf>, %256, %cst_105 [1] : vector<8x8xf32> to vector<8xf32>
    %258 = vector.shape_cast %257 : vector<8xf32> to vector<8x1xf32>
    %259 = vector.broadcast %258 : vector<8x1xf32> to vector<8x8xf32>
    %260 = arith.subf %256, %259 : vector<8x8xf32>
    %261 = math.exp %260 : vector<8x8xf32>
    %cst_106 = arith.constant dense<0.000000e+00> : vector<8xf32>
    %262 = vector.multi_reduction <add>, %261, %cst_106 [1] : vector<8x8xf32> to vector<8xf32>
    %263 = vector.shape_cast %262 : vector<8xf32> to vector<8x1xf32>
    %264 = tpu.reciprocal %263 {approx = true} : vector<8x1xf32> -> vector<8x1xf32>
    %265 = vector.broadcast %264 : vector<8x1xf32> to vector<8x8xf32>
    %266 = arith.mulf %261, %265 : vector<8x8xf32>
    %cst_107 = arith.constant dense<0.000000e+00> : vector<8x8xf32>
    %267 = tpu.matmul %266, %254, %cst_107 {dimension_numbers = #tpu.dot_dimension_numbers<[1], [0], [0], [1], [0, 0, 1, 1], [], []>} : vector<8x8xf32>, vector<8x8xf32>, vector<8x8xf32> -> vector<8x8xf32>
    %268 = vector.extract_strided_slice %235 {offsets = [0, 16], sizes = [8, 8], strides = [1, 1]} : vector<16x96xf32> to vector<8x8xf32>
    %269 = vector.extract_strided_slice %235 {offsets = [0, 48], sizes = [8, 8], strides = [1, 1]} : vector<16x96xf32> to vector<8x8xf32>
    %270 = vector.extract_strided_slice %235 {offsets = [0, 80], sizes = [8, 8], strides = [1, 1]} : vector<16x96xf32> to vector<8x8xf32>
    %cst_108 = arith.constant dense<0.000000e+00> : vector<8x8xf32>
    %271 = tpu.matmul %268, %269, %cst_108 {dimension_numbers = #tpu.dot_dimension_numbers<[1], [1], [0], [0], [0, 0, 1, 0], [], []>} : vector<8x8xf32>, vector<8x8xf32>, vector<8x8xf32> -> vector<8x8xf32>
    %272 = arith.addf %271, %13 : vector<8x8xf32>
    %cst_109 = arith.constant dense<0xFF800000> : vector<8xf32>
    %273 = vector.multi_reduction <maximumf>, %272, %cst_109 [1] : vector<8x8xf32> to vector<8xf32>
    %274 = vector.shape_cast %273 : vector<8xf32> to vector<8x1xf32>
    %275 = vector.broadcast %274 : vector<8x1xf32> to vector<8x8xf32>
    %276 = arith.subf %272, %275 : vector<8x8xf32>
    %277 = math.exp %276 : vector<8x8xf32>
    %cst_110 = arith.constant dense<0.000000e+00> : vector<8xf32>
    %278 = vector.multi_reduction <add>, %277, %cst_110 [1] : vector<8x8xf32> to vector<8xf32>
    %279 = vector.shape_cast %278 : vector<8xf32> to vector<8x1xf32>
    %280 = tpu.reciprocal %279 {approx = true} : vector<8x1xf32> -> vector<8x1xf32>
    %281 = vector.broadcast %280 : vector<8x1xf32> to vector<8x8xf32>
    %282 = arith.mulf %277, %281 : vector<8x8xf32>
    %cst_111 = arith.constant dense<0.000000e+00> : vector<8x8xf32>
    %283 = tpu.matmul %282, %270, %cst_111 {dimension_numbers = #tpu.dot_dimension_numbers<[1], [0], [0], [1], [0, 0, 1, 1], [], []>} : vector<8x8xf32>, vector<8x8xf32>, vector<8x8xf32> -> vector<8x8xf32>
    %284 = vector.extract_strided_slice %235 {offsets = [0, 24], sizes = [8, 8], strides = [1, 1]} : vector<16x96xf32> to vector<8x8xf32>
    %285 = vector.extract_strided_slice %235 {offsets = [0, 56], sizes = [8, 8], strides = [1, 1]} : vector<16x96xf32> to vector<8x8xf32>
    %286 = vector.extract_strided_slice %235 {offsets = [0, 88], sizes = [8, 8], strides = [1, 1]} : vector<16x96xf32> to vector<8x8xf32>
    %cst_112 = arith.constant dense<0.000000e+00> : vector<8x8xf32>
    %287 = tpu.matmul %284, %285, %cst_112 {dimension_numbers = #tpu.dot_dimension_numbers<[1], [1], [0], [0], [0, 0, 1, 0], [], []>} : vector<8x8xf32>, vector<8x8xf32>, vector<8x8xf32> -> vector<8x8xf32>
    %288 = arith.addf %287, %13 : vector<8x8xf32>
    %cst_113 = arith.constant dense<0xFF800000> : vector<8xf32>
    %289 = vector.multi_reduction <maximumf>, %288, %cst_113 [1] : vector<8x8xf32> to vector<8xf32>
    %290 = vector.shape_cast %289 : vector<8xf32> to vector<8x1xf32>
    %291 = vector.broadcast %290 : vector<8x1xf32> to vector<8x8xf32>
    %292 = arith.subf %288, %291 : vector<8x8xf32>
    %293 = math.exp %292 : vector<8x8xf32>
    %cst_114 = arith.constant dense<0.000000e+00> : vector<8xf32>
    %294 = vector.multi_reduction <add>, %293, %cst_114 [1] : vector<8x8xf32> to vector<8xf32>
    %295 = vector.shape_cast %294 : vector<8xf32> to vector<8x1xf32>
    %296 = tpu.reciprocal %295 {approx = true} : vector<8x1xf32> -> vector<8x1xf32>
    %297 = vector.broadcast %296 : vector<8x1xf32> to vector<8x8xf32>
    %298 = arith.mulf %293, %297 : vector<8x8xf32>
    %cst_115 = arith.constant dense<0.000000e+00> : vector<8x8xf32>
    %299 = tpu.matmul %298, %286, %cst_115 {dimension_numbers = #tpu.dot_dimension_numbers<[1], [0], [0], [1], [0, 0, 1, 1], [], []>} : vector<8x8xf32>, vector<8x8xf32>, vector<8x8xf32> -> vector<8x8xf32>
    %300 = tpu.concatenate %251, %267, %283, %299 in 1 : vector<8x8xf32>, vector<8x8xf32>, vector<8x8xf32>, vector<8x8xf32> -> vector<8x32xf32>
    %301 = vector.extract_strided_slice %235 {offsets = [8, 0], sizes = [8, 8], strides = [1, 1]} : vector<16x96xf32> to vector<8x8xf32>
    %302 = vector.extract_strided_slice %235 {offsets = [8, 32], sizes = [8, 8], strides = [1, 1]} : vector<16x96xf32> to vector<8x8xf32>
    %303 = vector.extract_strided_slice %235 {offsets = [8, 64], sizes = [8, 8], strides = [1, 1]} : vector<16x96xf32> to vector<8x8xf32>
    %cst_116 = arith.constant dense<0.000000e+00> : vector<8x8xf32>
    %304 = tpu.matmul %301, %302, %cst_116 {dimension_numbers = #tpu.dot_dimension_numbers<[1], [1], [0], [0], [0, 0, 1, 0], [], []>} : vector<8x8xf32>, vector<8x8xf32>, vector<8x8xf32> -> vector<8x8xf32>
    %305 = arith.addf %304, %13 : vector<8x8xf32>
    %cst_117 = arith.constant dense<0xFF800000> : vector<8xf32>
    %306 = vector.multi_reduction <maximumf>, %305, %cst_117 [1] : vector<8x8xf32> to vector<8xf32>
    %307 = vector.shape_cast %306 : vector<8xf32> to vector<8x1xf32>
    %308 = vector.broadcast %307 : vector<8x1xf32> to vector<8x8xf32>
    %309 = arith.subf %305, %308 : vector<8x8xf32>
    %310 = math.exp %309 : vector<8x8xf32>
    %cst_118 = arith.constant dense<0.000000e+00> : vector<8xf32>
    %311 = vector.multi_reduction <add>, %310, %cst_118 [1] : vector<8x8xf32> to vector<8xf32>
    %312 = vector.shape_cast %311 : vector<8xf32> to vector<8x1xf32>
    %313 = tpu.reciprocal %312 {approx = true} : vector<8x1xf32> -> vector<8x1xf32>
    %314 = vector.broadcast %313 : vector<8x1xf32> to vector<8x8xf32>
    %315 = arith.mulf %310, %314 : vector<8x8xf32>
    %cst_119 = arith.constant dense<0.000000e+00> : vector<8x8xf32>
    %316 = tpu.matmul %315, %303, %cst_119 {dimension_numbers = #tpu.dot_dimension_numbers<[1], [0], [0], [1], [0, 0, 1, 1], [], []>} : vector<8x8xf32>, vector<8x8xf32>, vector<8x8xf32> -> vector<8x8xf32>
    %317 = vector.extract_strided_slice %235 {offsets = [8, 8], sizes = [8, 8], strides = [1, 1]} : vector<16x96xf32> to vector<8x8xf32>
    %318 = vector.extract_strided_slice %235 {offsets = [8, 40], sizes = [8, 8], strides = [1, 1]} : vector<16x96xf32> to vector<8x8xf32>
    %319 = vector.extract_strided_slice %235 {offsets = [8, 72], sizes = [8, 8], strides = [1, 1]} : vector<16x96xf32> to vector<8x8xf32>
    %cst_120 = arith.constant dense<0.000000e+00> : vector<8x8xf32>
    %320 = tpu.matmul %317, %318, %cst_120 {dimension_numbers = #tpu.dot_dimension_numbers<[1], [1], [0], [0], [0, 0, 1, 0], [], []>} : vector<8x8xf32>, vector<8x8xf32>, vector<8x8xf32> -> vector<8x8xf32>
    %321 = arith.addf %320, %13 : vector<8x8xf32>
    %cst_121 = arith.constant dense<0xFF800000> : vector<8xf32>
    %322 = vector.multi_reduction <maximumf>, %321, %cst_121 [1] : vector<8x8xf32> to vector<8xf32>
    %323 = vector.shape_cast %322 : vector<8xf32> to vector<8x1xf32>
    %324 = vector.broadcast %323 : vector<8x1xf32> to vector<8x8xf32>
    %325 = arith.subf %321, %324 : vector<8x8xf32>
    %326 = math.exp %325 : vector<8x8xf32>
    %cst_122 = arith.constant dense<0.000000e+00> : vector<8xf32>
    %327 = vector.multi_reduction <add>, %326, %cst_122 [1] : vector<8x8xf32> to vector<8xf32>
    %328 = vector.shape_cast %327 : vector<8xf32> to vector<8x1xf32>
    %329 = tpu.reciprocal %328 {approx = true} : vector<8x1xf32> -> vector<8x1xf32>
    %330 = vector.broadcast %329 : vector<8x1xf32> to vector<8x8xf32>
    %331 = arith.mulf %326, %330 : vector<8x8xf32>
    %cst_123 = arith.constant dense<0.000000e+00> : vector<8x8xf32>
    %332 = tpu.matmul %331, %319, %cst_123 {dimension_numbers = #tpu.dot_dimension_numbers<[1], [0], [0], [1], [0, 0, 1, 1], [], []>} : vector<8x8xf32>, vector<8x8xf32>, vector<8x8xf32> -> vector<8x8xf32>
    %333 = vector.extract_strided_slice %235 {offsets = [8, 16], sizes = [8, 8], strides = [1, 1]} : vector<16x96xf32> to vector<8x8xf32>
    %334 = vector.extract_strided_slice %235 {offsets = [8, 48], sizes = [8, 8], strides = [1, 1]} : vector<16x96xf32> to vector<8x8xf32>
    %335 = vector.extract_strided_slice %235 {offsets = [8, 80], sizes = [8, 8], strides = [1, 1]} : vector<16x96xf32> to vector<8x8xf32>
    %cst_124 = arith.constant dense<0.000000e+00> : vector<8x8xf32>
    %336 = tpu.matmul %333, %334, %cst_124 {dimension_numbers = #tpu.dot_dimension_numbers<[1], [1], [0], [0], [0, 0, 1, 0], [], []>} : vector<8x8xf32>, vector<8x8xf32>, vector<8x8xf32> -> vector<8x8xf32>
    %337 = arith.addf %336, %13 : vector<8x8xf32>
    %cst_125 = arith.constant dense<0xFF800000> : vector<8xf32>
    %338 = vector.multi_reduction <maximumf>, %337, %cst_125 [1] : vector<8x8xf32> to vector<8xf32>
    %339 = vector.shape_cast %338 : vector<8xf32> to vector<8x1xf32>
    %340 = vector.broadcast %339 : vector<8x1xf32> to vector<8x8xf32>
    %341 = arith.subf %337, %340 : vector<8x8xf32>
    %342 = math.exp %341 : vector<8x8xf32>
    %cst_126 = arith.constant dense<0.000000e+00> : vector<8xf32>
    %343 = vector.multi_reduction <add>, %342, %cst_126 [1] : vector<8x8xf32> to vector<8xf32>
    %344 = vector.shape_cast %343 : vector<8xf32> to vector<8x1xf32>
    %345 = tpu.reciprocal %344 {approx = true} : vector<8x1xf32> -> vector<8x1xf32>
    %346 = vector.broadcast %345 : vector<8x1xf32> to vector<8x8xf32>
    %347 = arith.mulf %342, %346 : vector<8x8xf32>
    %cst_127 = arith.constant dense<0.000000e+00> : vector<8x8xf32>
    %348 = tpu.matmul %347, %335, %cst_127 {dimension_numbers = #tpu.dot_dimension_numbers<[1], [0], [0], [1], [0, 0, 1, 1], [], []>} : vector<8x8xf32>, vector<8x8xf32>, vector<8x8xf32> -> vector<8x8xf32>
    %349 = vector.extract_strided_slice %235 {offsets = [8, 24], sizes = [8, 8], strides = [1, 1]} : vector<16x96xf32> to vector<8x8xf32>
    %350 = vector.extract_strided_slice %235 {offsets = [8, 56], sizes = [8, 8], strides = [1, 1]} : vector<16x96xf32> to vector<8x8xf32>
    %351 = vector.extract_strided_slice %235 {offsets = [8, 88], sizes = [8, 8], strides = [1, 1]} : vector<16x96xf32> to vector<8x8xf32>
    %cst_128 = arith.constant dense<0.000000e+00> : vector<8x8xf32>
    %352 = tpu.matmul %349, %350, %cst_128 {dimension_numbers = #tpu.dot_dimension_numbers<[1], [1], [0], [0], [0, 0, 1, 0], [], []>} : vector<8x8xf32>, vector<8x8xf32>, vector<8x8xf32> -> vector<8x8xf32>
    %353 = arith.addf %352, %13 : vector<8x8xf32>
    %cst_129 = arith.constant dense<0xFF800000> : vector<8xf32>
    %354 = vector.multi_reduction <maximumf>, %353, %cst_129 [1] : vector<8x8xf32> to vector<8xf32>
    %355 = vector.shape_cast %354 : vector<8xf32> to vector<8x1xf32>
    %356 = vector.broadcast %355 : vector<8x1xf32> to vector<8x8xf32>
    %357 = arith.subf %353, %356 : vector<8x8xf32>
    %358 = math.exp %357 : vector<8x8xf32>
    %cst_130 = arith.constant dense<0.000000e+00> : vector<8xf32>
    %359 = vector.multi_reduction <add>, %358, %cst_130 [1] : vector<8x8xf32> to vector<8xf32>
    %360 = vector.shape_cast %359 : vector<8xf32> to vector<8x1xf32>
    %361 = tpu.reciprocal %360 {approx = true} : vector<8x1xf32> -> vector<8x1xf32>
    %362 = vector.broadcast %361 : vector<8x1xf32> to vector<8x8xf32>
    %363 = arith.mulf %358, %362 : vector<8x8xf32>
    %cst_131 = arith.constant dense<0.000000e+00> : vector<8x8xf32>
    %364 = tpu.matmul %363, %351, %cst_131 {dimension_numbers = #tpu.dot_dimension_numbers<[1], [0], [0], [1], [0, 0, 1, 1], [], []>} : vector<8x8xf32>, vector<8x8xf32>, vector<8x8xf32> -> vector<8x8xf32>
    %365 = tpu.concatenate %316, %332, %348, %364 in 1 : vector<8x8xf32>, vector<8x8xf32>, vector<8x8xf32>, vector<8x8xf32> -> vector<8x32xf32>
    %366 = tpu.concatenate %300, %365 in 0 : vector<8x32xf32>, vector<8x32xf32> -> vector<16x32xf32>
    %c1_132 = arith.constant 1 : index
    %c0_133 = arith.constant 0 : index
    %c0_134 = arith.constant 0 : index
    %367 = vector.load %arg6[%c1_132, %c0_133, %c0_134] : memref<2x32x32xf32, #tpu.memory_space<vmem>>, vector<1x32x32xf32>
    %368 = vector.shape_cast %367 : vector<1x32x32xf32> to vector<32x32xf32>
    %cst_135 = arith.constant dense<0.000000e+00> : vector<16x32xf32>
    %369 = tpu.matmul %366, %368, %cst_135 {dimension_numbers = #tpu.dot_dimension_numbers<[1], [0], [0], [1], [0, 0, 1, 1], [], []>} : vector<16x32xf32>, vector<32x32xf32>, vector<16x32xf32> -> vector<16x32xf32>
    %c1_136 = arith.constant 1 : index
    %c0_137 = arith.constant 0 : index
    %c0_138 = arith.constant 0 : index
    %370 = vector.load %arg7[%c1_136, %c0_137, %c0_138] : memref<2x1x32xf32, #tpu.memory_space<vmem>>, vector<1x1x32xf32>
    %371 = vector.shape_cast %370 : vector<1x1x32xf32> to vector<1x32xf32>
    %372 = vector.broadcast %371 : vector<1x32xf32> to vector<16x32xf32>
    %373 = arith.addf %369, %372 : vector<16x32xf32>
    %374 = arith.addf %228, %373 : vector<16x32xf32>
    %c1_139 = arith.constant 1 : index
    %c0_140 = arith.constant 0 : index
    %c0_141 = arith.constant 0 : index
    %375 = vector.load %arg12[%c1_139, %c0_140, %c0_141] : memref<2x1x32xf32, #tpu.memory_space<vmem>>, vector<1x1x32xf32>
    %376 = vector.shape_cast %375 : vector<1x1x32xf32> to vector<1x32xf32>
    %c1_142 = arith.constant 1 : index
    %c0_143 = arith.constant 0 : index
    %c0_144 = arith.constant 0 : index
    %377 = vector.load %arg13[%c1_142, %c0_143, %c0_144] : memref<2x1x32xf32, #tpu.memory_space<vmem>>, vector<1x1x32xf32>
    %378 = vector.shape_cast %377 : vector<1x1x32xf32> to vector<1x32xf32>
    %cst_145 = arith.constant dense<0.000000e+00> : vector<16xf32>
    %379 = vector.multi_reduction <add>, %374, %cst_145 [1] : vector<16x32xf32> to vector<16xf32>
    %380 = vector.shape_cast %379 : vector<16xf32> to vector<16x1xf32>
    %cst_146 = arith.constant 3.200000e+01 : f32
    %381 = vector.broadcast %cst_146 : f32 to vector<16x1xf32>
    %382 = arith.divf %380, %381 : vector<16x1xf32>
    %383 = vector.broadcast %382 : vector<16x1xf32> to vector<16x32xf32>
    %384 = arith.subf %374, %383 : vector<16x32xf32>
    %385 = arith.mulf %384, %384 : vector<16x32xf32>
    %cst_147 = arith.constant dense<0.000000e+00> : vector<16xf32>
    %386 = vector.multi_reduction <add>, %385, %cst_147 [1] : vector<16x32xf32> to vector<16xf32>
    %387 = vector.shape_cast %386 : vector<16xf32> to vector<16x1xf32>
    %cst_148 = arith.constant 3.200000e+01 : f32
    %388 = vector.broadcast %cst_148 : f32 to vector<16x1xf32>
    %389 = arith.divf %387, %388 : vector<16x1xf32>
    %390 = vector.broadcast %382 : vector<16x1xf32> to vector<16x32xf32>
    %391 = arith.subf %374, %390 : vector<16x32xf32>
    %cst_149 = arith.constant 9.99999974E-6 : f32
    %392 = vector.broadcast %cst_149 : f32 to vector<16x1xf32>
    %393 = arith.addf %389, %392 : vector<16x1xf32>
    %394 = math.rsqrt %393 : vector<16x1xf32>
    %395 = vector.broadcast %394 : vector<16x1xf32> to vector<16x32xf32>
    %396 = arith.mulf %391, %395 : vector<16x32xf32>
    %397 = vector.broadcast %376 : vector<1x32xf32> to vector<16x32xf32>
    %398 = arith.mulf %396, %397 : vector<16x32xf32>
    %399 = vector.broadcast %378 : vector<1x32xf32> to vector<16x32xf32>
    %400 = arith.addf %398, %399 : vector<16x32xf32>
    %c1_150 = arith.constant 1 : index
    %c0_151 = arith.constant 0 : index
    %c0_152 = arith.constant 0 : index
    %401 = vector.load %arg8[%c1_150, %c0_151, %c0_152] : memref<2x32x64xf32, #tpu.memory_space<vmem>>, vector<1x32x64xf32>
    %402 = vector.shape_cast %401 : vector<1x32x64xf32> to vector<32x64xf32>
    %cst_153 = arith.constant dense<0.000000e+00> : vector<16x64xf32>
    %403 = tpu.matmul %400, %402, %cst_153 {dimension_numbers = #tpu.dot_dimension_numbers<[1], [0], [0], [1], [0, 0, 1, 1], [], []>} : vector<16x32xf32>, vector<32x64xf32>, vector<16x64xf32> -> vector<16x64xf32>
    %c1_154 = arith.constant 1 : index
    %c0_155 = arith.constant 0 : index
    %c0_156 = arith.constant 0 : index
    %404 = vector.load %arg9[%c1_154, %c0_155, %c0_156] : memref<2x1x64xf32, #tpu.memory_space<vmem>>, vector<1x1x64xf32>
    %405 = vector.shape_cast %404 : vector<1x1x64xf32> to vector<1x64xf32>
    %406 = vector.broadcast %405 : vector<1x64xf32> to vector<16x64xf32>
    %407 = arith.addf %403, %406 : vector<16x64xf32>
    %cst_157 = arith.constant 0.000000e+00 : f32
    %408 = vector.broadcast %cst_157 : f32 to vector<16x64xf32>
    %409 = arith.maximumf %407, %408 : vector<16x64xf32>
    %c1_158 = arith.constant 1 : index
    %c0_159 = arith.constant 0 : index
    %c0_160 = arith.constant 0 : index
    %410 = vector.load %arg10[%c1_158, %c0_159, %c0_160] : memref<2x64x32xf32, #tpu.memory_space<vmem>>, vector<1x64x32xf32>
    %411 = vector.shape_cast %410 : vector<1x64x32xf32> to vector<64x32xf32>
    %cst_161 = arith.constant dense<0.000000e+00> : vector<16x32xf32>
    %412 = tpu.matmul %409, %411, %cst_161 {dimension_numbers = #tpu.dot_dimension_numbers<[1], [0], [0], [1], [0, 0, 1, 1], [], []>} : vector<16x64xf32>, vector<64x32xf32>, vector<16x32xf32> -> vector<16x32xf32>
    %c1_162 = arith.constant 1 : index
    %c0_163 = arith.constant 0 : index
    %c0_164 = arith.constant 0 : index
    %413 = vector.load %arg11[%c1_162, %c0_163, %c0_164] : memref<2x1x32xf32, #tpu.memory_space<vmem>>, vector<1x1x32xf32>
    %414 = vector.shape_cast %413 : vector<1x1x32xf32> to vector<1x32xf32>
    %415 = vector.broadcast %414 : vector<1x32xf32> to vector<16x32xf32>
    %416 = arith.addf %412, %415 : vector<16x32xf32>
    %417 = arith.addf %400, %416 : vector<16x32xf32>
    %c1_165 = arith.constant 1 : index
    %c0_166 = arith.constant 0 : index
    %c0_167 = arith.constant 0 : index
    %418 = vector.load %arg14[%c1_165, %c0_166, %c0_167] : memref<2x1x32xf32, #tpu.memory_space<vmem>>, vector<1x1x32xf32>
    %419 = vector.shape_cast %418 : vector<1x1x32xf32> to vector<1x32xf32>
    %c1_168 = arith.constant 1 : index
    %c0_169 = arith.constant 0 : index
    %c0_170 = arith.constant 0 : index
    %420 = vector.load %arg15[%c1_168, %c0_169, %c0_170] : memref<2x1x32xf32, #tpu.memory_space<vmem>>, vector<1x1x32xf32>
    %421 = vector.shape_cast %420 : vector<1x1x32xf32> to vector<1x32xf32>
    %cst_171 = arith.constant dense<0.000000e+00> : vector<16xf32>
    %422 = vector.multi_reduction <add>, %417, %cst_171 [1] : vector<16x32xf32> to vector<16xf32>
    %423 = vector.shape_cast %422 : vector<16xf32> to vector<16x1xf32>
    %cst_172 = arith.constant 3.200000e+01 : f32
    %424 = vector.broadcast %cst_172 : f32 to vector<16x1xf32>
    %425 = arith.divf %423, %424 : vector<16x1xf32>
    %426 = vector.broadcast %425 : vector<16x1xf32> to vector<16x32xf32>
    %427 = arith.subf %417, %426 : vector<16x32xf32>
    %428 = arith.mulf %427, %427 : vector<16x32xf32>
    %cst_173 = arith.constant dense<0.000000e+00> : vector<16xf32>
    %429 = vector.multi_reduction <add>, %428, %cst_173 [1] : vector<16x32xf32> to vector<16xf32>
    %430 = vector.shape_cast %429 : vector<16xf32> to vector<16x1xf32>
    %cst_174 = arith.constant 3.200000e+01 : f32
    %431 = vector.broadcast %cst_174 : f32 to vector<16x1xf32>
    %432 = arith.divf %430, %431 : vector<16x1xf32>
    %433 = vector.broadcast %425 : vector<16x1xf32> to vector<16x32xf32>
    %434 = arith.subf %417, %433 : vector<16x32xf32>
    %cst_175 = arith.constant 9.99999974E-6 : f32
    %435 = vector.broadcast %cst_175 : f32 to vector<16x1xf32>
    %436 = arith.addf %432, %435 : vector<16x1xf32>
    %437 = math.rsqrt %436 : vector<16x1xf32>
    %438 = vector.broadcast %437 : vector<16x1xf32> to vector<16x32xf32>
    %439 = arith.mulf %434, %438 : vector<16x32xf32>
    %440 = vector.broadcast %419 : vector<1x32xf32> to vector<16x32xf32>
    %441 = arith.mulf %439, %440 : vector<16x32xf32>
    %442 = vector.broadcast %421 : vector<1x32xf32> to vector<16x32xf32>
    %443 = arith.addf %441, %442 : vector<16x32xf32>
    %444 = vector.extract_strided_slice %443 {offsets = [0, 0], sizes = [8, 32], strides = [1, 1]} : vector<16x32xf32> to vector<8x32xf32>
    %c0_176 = arith.constant 0 : index
    %c0_177 = arith.constant 0 : index
    %c0_178 = arith.constant 0 : index
    %445 = vector.load %arg16[%c0_176, %c0_177, %c0_178] : memref<8x2x32xf32, #tpu.memory_space<vmem>>, vector<8x1x32xf32>
    %446 = vector.shape_cast %445 : vector<8x1x32xf32> to vector<8x32xf32>
    %447 = vector.shape_cast %444 : vector<8x32xf32> to vector<8x1x32xf32>
    tpu.vector_store %arg16[%c0_176, %c0_177, %c0_178], %447 {strides = array<i32>} : memref<8x2x32xf32, #tpu.memory_space<vmem>>, vector<8x1x32xf32>,
    %448 = vector.extract_strided_slice %443 {offsets = [8, 0], sizes = [8, 32], strides = [1, 1]} : vector<16x32xf32> to vector<8x32xf32>
    %c0_179 = arith.constant 0 : index
    %c1_180 = arith.constant 1 : index
    %c0_181 = arith.constant 0 : index
    %449 = vector.load %arg16[%c0_179, %c1_180, %c0_181] : memref<8x2x32xf32, #tpu.memory_space<vmem>>, vector<8x1x32xf32>
    %450 = vector.shape_cast %449 : vector<8x1x32xf32> to vector<8x32xf32>
    %451 = vector.shape_cast %448 : vector<8x32xf32> to vector<8x1x32xf32>
    tpu.vector_store %arg16[%c0_179, %c1_180, %c0_181], %451 {strides = array<i32>} : memref<8x2x32xf32, #tpu.memory_space<vmem>>, vector<8x1x32xf32>,
    return
  }
  func.func @transform_0(%arg0: i32) -> (i32, i32, i32) {
    %c0_i32 = arith.constant 0 : i32
    %c0_i32_0 = arith.constant 0 : i32
    %c0_i32_1 = arith.constant 0 : i32
    %c0_i32_2 = arith.constant 0 : i32
    return %c0_i32, %c0_i32_0, %c0_i32_1 : i32, i32, i32
  }
  func.func @transform_1(%arg0: i32) -> (i32, i32, i32) {
    %c0_i32 = arith.constant 0 : i32
    %c0_i32_0 = arith.constant 0 : i32
    %c0_i32_1 = arith.constant 0 : i32
    %c0_i32_2 = arith.constant 0 : i32
    return %c0_i32, %c0_i32_0, %c0_i32_1 : i32, i32, i32
  }
  func.func @transform_2(%arg0: i32) -> (i32, i32) {
    %c0_i32 = arith.constant 0 : i32
    %c0_i32_0 = arith.constant 0 : i32
    %c0_i32_1 = arith.constant 0 : i32
    return %c0_i32, %c0_i32_0 : i32, i32
  }
  func.func @transform_3(%arg0: i32) -> (i32, i32, i32) {
    %c0_i32 = arith.constant 0 : i32
    %c0_i32_0 = arith.constant 0 : i32
    %c0_i32_1 = arith.constant 0 : i32
    %c0_i32_2 = arith.constant 0 : i32
    return %c0_i32, %c0_i32_0, %c0_i32_1 : i32, i32, i32
  }
  func.func @transform_4(%arg0: i32) -> (i32, i32, i32) {
    %c0_i32 = arith.constant 0 : i32
    %c0_i32_0 = arith.constant 0 : i32
    %c0_i32_1 = arith.constant 0 : i32
    %c0_i32_2 = arith.constant 0 : i32
    return %c0_i32, %c0_i32_0, %c0_i32_1 : i32, i32, i32
  }
  func.func @transform_5(%arg0: i32) -> (i32, i32, i32) {
    %c0_i32 = arith.constant 0 : i32
    %c0_i32_0 = arith.constant 0 : i32
    %c0_i32_1 = arith.constant 0 : i32
    %c0_i32_2 = arith.constant 0 : i32
    return %c0_i32, %c0_i32_0, %c0_i32_1 : i32, i32, i32
  }
  func.func @transform_6(%arg0: i32) -> (i32, i32, i32) {
    %c0_i32 = arith.constant 0 : i32
    %c0_i32_0 = arith.constant 0 : i32
    %c0_i32_1 = arith.constant 0 : i32
    %c0_i32_2 = arith.constant 0 : i32
    return %c0_i32, %c0_i32_0, %c0_i32_1 : i32, i32, i32
  }
  func.func @transform_7(%arg0: i32) -> (i32, i32, i32) {
    %c0_i32 = arith.constant 0 : i32
    %c0_i32_0 = arith.constant 0 : i32
    %c0_i32_1 = arith.constant 0 : i32
    %c0_i32_2 = arith.constant 0 : i32
    return %c0_i32, %c0_i32_0, %c0_i32_1 : i32, i32, i32
  }
  func.func @transform_8(%arg0: i32) -> (i32, i32, i32) {
    %c0_i32 = arith.constant 0 : i32
    %c0_i32_0 = arith.constant 0 : i32
    %c0_i32_1 = arith.constant 0 : i32
    %c0_i32_2 = arith.constant 0 : i32
    return %c0_i32, %c0_i32_0, %c0_i32_1 : i32, i32, i32
  }
  func.func @transform_9(%arg0: i32) -> (i32, i32, i32) {
    %c0_i32 = arith.constant 0 : i32
    %c0_i32_0 = arith.constant 0 : i32
    %c0_i32_1 = arith.constant 0 : i32
    %c0_i32_2 = arith.constant 0 : i32
    return %c0_i32, %c0_i32_0, %c0_i32_1 : i32, i32, i32
  }
  func.func @transform_10(%arg0: i32) -> (i32, i32, i32) {
    %c0_i32 = arith.constant 0 : i32
    %c0_i32_0 = arith.constant 0 : i32
    %c0_i32_1 = arith.constant 0 : i32
    %c0_i32_2 = arith.constant 0 : i32
    return %c0_i32, %c0_i32_0, %c0_i32_1 : i32, i32, i32
  }
  func.func @transform_11(%arg0: i32) -> (i32, i32, i32) {
    %c0_i32 = arith.constant 0 : i32
    %c0_i32_0 = arith.constant 0 : i32
    %c0_i32_1 = arith.constant 0 : i32
    %c0_i32_2 = arith.constant 0 : i32
    return %c0_i32, %c0_i32_0, %c0_i32_1 : i32, i32, i32
  }
  func.func @transform_12(%arg0: i32) -> (i32, i32, i32) {
    %c0_i32 = arith.constant 0 : i32
    %c0_i32_0 = arith.constant 0 : i32
    %c0_i32_1 = arith.constant 0 : i32
    %c0_i32_2 = arith.constant 0 : i32
    return %c0_i32, %c0_i32_0, %c0_i32_1 : i32, i32, i32
  }
  func.func @transform_13(%arg0: i32) -> (i32, i32, i32) {
    %c0_i32 = arith.constant 0 : i32
    %c0_i32_0 = arith.constant 0 : i32
    %c0_i32_1 = arith.constant 0 : i32
    %c0_i32_2 = arith.constant 0 : i32
    return %c0_i32, %c0_i32_0, %c0_i32_1 : i32, i32, i32
  }
  func.func @transform_14(%arg0: i32) -> (i32, i32, i32) {
    %c0_i32 = arith.constant 0 : i32
    %c0_i32_0 = arith.constant 0 : i32
    %c0_i32_1 = arith.constant 0 : i32
    %c0_i32_2 = arith.constant 0 : i32
    return %c0_i32, %c0_i32_0, %c0_i32_1 : i32, i32, i32
  }
  func.func @transform_15(%arg0: i32) -> (i32, i32, i32) {
    %c0_i32 = arith.constant 0 : i32
    %c0_i32_0 = arith.constant 0 : i32
    %c0_i32_1 = arith.constant 0 : i32
    %c0_i32_2 = arith.constant 0 : i32
    return %c0_i32, %c0_i32_0, %c0_i32_1 : i32, i32, i32
  }
}

</mosaic_0001>

<bundles_post_ra>
// kernel: tpu_custom_call.1
= control target key start
LH: loop header
LB: loop body
LE: loop exit
PB: predicated region body
PF: predicated region fallthrough
CT: control target
= control target key end

     0   :  { %vm116_vm0 = vcmask 1041409   ;;  %vm119_vm1 = vcmask 1042434   ;;  %vm122_vm2 = vcmask 1043459   ;;  %vm125_vm3 = vcmask 1044484   ;;  %s5346_s0 = inlined_call_operand.vmem [shape: f32[8,2,32], index: 0, kind: input, shape index: {}]   ;;  %s5347_s1 = inlined_call_operand.vmem [shape: f32[500,1,32], index: 1, kind: input, shape index: {}]   ;;  %s5348_s2 = inlined_call_operand.vmem [shape: f32[8,8], index: 2, kind: input, shape index: {}]   ;;  %s5349_s3 = inlined_call_operand.vmem [shape: f32[2,32,96], index: 3, kind: input, shape index: {}]   ;;  %s5350_s4 = inlined_call_operand.vmem [shape: f32[2,1,96], index: 4, kind: input, shape index: {}]   ;;  %s5351_s5 = inlined_call_operand.vmem [shape: f32[2,32,32], index: 5, kind: input, shape index: {}]   ;;  %s5352_s6 = inlined_call_operand.vmem [shape: f32[2,1,32], index: 6, kind: input, shape index: {}]   ;;  %s5353_s7 = inlined_call_operand.vmem [shape: f32[2,32,64], index: 7, kind: input, shape index: {}]   ;;  %s5354_s8 = inlined_call_operand.vmem [shape: f32[2,1,64], index: 8, kind: input, shape index: {}]   ;;  %s5355_s9 = inlined_call_operand.vmem [shape: f32[2,64,32], index: 9, kind: input, shape index: {}]   ;;  %s5356_s10 = inlined_call_operand.vmem [shape: f32[2,1,32], index: 10, kind: input, shape index: {}]   ;;  %s5357_s11 = inlined_call_operand.vmem [shape: f32[2,1,32], index: 11, kind: input, shape index: {}]   ;;  %s5358_s12 = inlined_call_operand.vmem [shape: f32[2,1,32], index: 12, kind: input, shape index: {}]   ;;  %s5359_s13 = inlined_call_operand.vmem [shape: f32[2,1,32], index: 13, kind: input, shape index: {}]   ;;  %s5360_s14 = inlined_call_operand.vmem [shape: f32[2,1,32], index: 14, kind: input, shape index: {}]   ;;  %s5361_s15 = inlined_call_operand.hbm [shape: f32[8,2,32], index: 15, kind: output, shape index: {}]  }
   0x1   :  { %v164_v0 = vld [vmem:[%s5349_s3 + $0x18] sm:$0xff]  ;;  %v163_v1 = vld [vmem:[%s5349_s3 + $0x10] sm:$0xff]  ;;  %v162_v2 = vld [vmem:[%s5349_s3 + $0x8] sm:$0xff] }
   0x2   :  { %4182 = vmatprep.subr.mxu1 %v164_v0  ;;  %v161_v3 = vld [vmem:[%s5349_s3] sm:$0xff]  ;;  %v63_v8 = vld [vmem:[%s5346_s0 + $0x8] sm:$0x1]  ;;  %v64_v9 = vld [vmem:[%s5346_s0 + $0xa] sm:$0x1] }
   0x3   :  { %4183 = vmatpush3.msra.mxu1 %v164_v0  ;;  %v59_v4 = vld [vmem:[%s5346_s0] sm:$0x1]  ;;  %v60_v5 = vld [vmem:[%s5346_s0 + $0x2] sm:$0x1]  ;;  %v61_v6 = vld [vmem:[%s5346_s0 + $0x4] sm:$0x1] }
   0x4   :  { %4184 = vmatprep.subr.mxu1 %v163_v1  ;;  %v62_v7 = vld [vmem:[%s5346_s0 + $0x6] sm:$0x1]  ;;  %v51_v10 = vld [vmem:[%s5347_s1] sm:$0x1]  ;;  %v52_v11 = vld [vmem:[%s5347_s1 + $0x1] sm:$0x1] }
   0x5   :  { %4185 = vmatpush3.msra.mxu1 %v163_v1  ;;  %v53_v12 = vld [vmem:[%s5347_s1 + $0x2] sm:$0x1]  ;;  %v54_v13 = vld [vmem:[%s5347_s1 + $0x3] sm:$0x1]  ;;  %v65_v14 = vld [vmem:[%s5346_s0 + $0xc] sm:$0x1] }
   0x6   :  { %4186 = vmatprep.subr.mxu1 %v162_v2  ;;  %v66_v15 = vld [vmem:[%s5346_s0 + $0xe] sm:$0x1]  ;;  %v67_v16 = vmul.f32 5.656854, %v59_v4  ;;  %v55_v17 = vld [vmem:[%s5347_s1 + $0x4] sm:$0x1] }
   0x7   :  { %4187 = vmatpush3.msra.mxu1 %v162_v2  ;;  %v68_v18 = vmul.f32 5.656854, %v60_v5  ;;  %v69_v19 = vmul.f32 5.656854, %v61_v6  ;;  %v70_v20 = vmul.f32 5.656854, %v62_v7 }
   0x8   :  { %4188 = vmatprep.subr.mxu1 %v161_v3  ;;  %v56_v21 = vld [vmem:[%s5347_s1 + $0x5] sm:$0x1]  ;;  %v71_v22 = vmul.f32 5.656854, %v63_v8  ;;  %v72_v23 = vmul.f32 5.656854, %v64_v9  ;;  %v75_v33 = vadd.f32 %v67_v16, %v51_v10 }
   0x9   :  { %4189 = vmatpush3.msra.mxu1 %v161_v3  ;;  %v73_v24 = vmul.f32 5.656854, %v65_v14  ;;  %v57_v25 = vld [vmem:[%s5347_s1 + $0x6] sm:$0x1]  ;;  %v58_v26 = vld [vmem:[%s5347_s1 + $0x7] sm:$0x1]  ;;  %v76_v34 = vadd.f32 %v68_v18, %v52_v11  ;;  %v77_v35 = vadd.f32 %v69_v19, %v53_v12  ;;  %v78_v36 = vadd.f32 %v70_v20, %v54_v13 }
   0xa   :  { %v74_v27 = vmul.f32 5.656854, %v66_v15  ;;  %v83_v28 = vld [vmem:[%s5346_s0 + $0x1] sm:$0x1]  ;;  %v84_v29 = vld [vmem:[%s5346_s0 + $0x3] sm:$0x1]  ;;  %v79_v40 = vadd.f32 %v71_v22, %v55_v17  ;;  %v80_v44 = vadd.f32 %v72_v23, %v56_v21 }
   0xb   :  { %v85_v30 = vld [vmem:[%s5346_s0 + $0x5] sm:$0x1]  ;;  %v86_v31 = vld [vmem:[%s5346_s0 + $0x7] sm:$0x1]  ;;  %v87_v32 = vld [vmem:[%s5346_s0 + $0x9] sm:$0x1]  ;;  %v81_v48 = vadd.f32 %v73_v24, %v57_v25 }
   0xc   :  { %v88_v37 = vld [vmem:[%s5346_s0 + $0xb] sm:$0x1]  ;;  %v89_v38 = vld [vmem:[%s5346_s0 + $0xd] sm:$0x1]  ;;  %v90_v39 = vld [vmem:[%s5346_s0 + $0xf] sm:$0x1]  ;;  %v82_v49 = vadd.f32 %v74_v27, %v58_v26 }
   0xd   :  { %v91_v41 = vmul.f32 5.656854, %v83_v28  ;;  %v92_v42 = vmul.f32 5.656854, %v84_v29  ;;  %v93_v43 = vmul.f32 5.656854, %v85_v30 }
   0xe   :  { %v94_v45 = vmul.f32 5.656854, %v86_v31  ;;  %v95_v46 = vmul.f32 5.656854, %v87_v32  ;;  %v96_v47 = vmul.f32 5.656854, %v88_v37 }
   0xf   :  { %v97_v50 = vmul.f32 5.656854, %v89_v38  ;;  %v98_v51 = vmul.f32 5.656854, %v90_v39 }
  0x10   :  { %20 = vsyncpa [#allocation3], 0  ;;  %v99_v52 = vadd.f32 %v91_v41, %v51_v10  ;;  %v100_v53 = vadd.f32 %v92_v42, %v52_v11  ;;  %v101_v54 = vadd.f32 %v93_v43, %v53_v12  ;;  %v102_v55 = vadd.f32 %v94_v45, %v54_v13  ;;  %s4570_s29 = smov 120   ;;  %s4571_s30 = smov 96   ;;  %v4860_v45 = vld [vmem:[%s5348_s2] sm:$0xff] }
  0x11   :  { %v103_v56 = vadd.f32 %v95_v46, %v55_v17  ;;  %v104_v57 = vadd.f32 %v96_v47, %v56_v21  ;;  %v115_v58 = vrot.slane %v76_v34, 7  ;;  %v118_v59 = vrot.slane %v77_v35, 6  ;;  %s4572_s16 = smov 80   ;;  %s4573_s17 = smov 88  }
  0x12   :  { %v105_v60 = vadd.f32 %v97_v50, %v57_v25  ;;  %v106_v61 = vadd.f32 %v98_v51, %v58_v26  ;;  %v121_v62 = vrot.slane %v78_v36, 5  ;;  %v124_v63 = vrot.slane %v79_v40, 4  ;;  %v3954_v26 = vld [vmem:[%s5350_s4] ss:$0 sm:$0xff]  ;;  %s4574_s18 = smov 72   ;;  %s4575_s19 = smov 112  }
  0x13   :  { %v117_v0 = vsel %vm116_vm0, %v115_v58, %v75_v33  ;;  %v127_v1 = vrot.slane %v80_v44, 3  ;;  %vm128_vm4 = vcmask 1045509   ;;  %v130_v2 = vrot.slane %v81_v48, 2  ;;  %s4576_s20 = smov 104   ;;  %s5366_s21 = smov 56  }
  0x14   :  { %v120_v3 = vsel %vm119_vm1, %v118_v59, %v117_v0  ;;  %vm131_vm5 = vcmask 1046534   ;;  %v133_v4 = vrot.slane %v82_v49, 1  ;;  %v145_v5 = vrot.slane %v100_v53, 7  ;;  %s5368_s1 = smov 64   ;;  %s5364_s2 = smov 40  }
  0x15   :  { %v123_v6 = vsel %vm122_vm2, %v121_v62, %v120_v3  ;;  %v147_v7 = vrot.slane %v101_v54, 6  ;;  %v149_v8 = vrot.slane %v102_v55, 5  ;;  %v151_v9 = vrot.slane %v103_v56, 4  ;;  %s5362_s24 = smov 48   ;;  %s4581_s25 = smov 8  }
  0x16   :  { %v126_v10 = vsel %vm125_vm3, %v124_v63, %v123_v6  ;;  %vm134_vm6 = vcmask 1047559   ;;  %v146_v11 = vsel %vm116_vm0, %v145_v5, %v99_v52  ;;  %v153_v12 = vrot.slane %v104_v57, 3  ;;  %s4582_s26 = smov 16   ;;  %s4583_s27 = smov 24  }
  0x17   :  { %v129_v13 = vsel %vm128_vm4, %v127_v1, %v126_v10  ;;  %vm172_vm7 = vcmask 261120   ;;  %v148_v14 = vsel %vm119_vm1, %v147_v7, %v146_v11  ;;  %v155_v15 = vrot.slane %v105_v60, 2 }
  0x18   :  { %v132_v16 = vsel %vm131_vm5, %v130_v2, %v129_v13  ;;  %v150_v17 = vsel %vm122_vm2, %v149_v8, %v148_v14  ;;  %v157_v18 = vrot.slane %v106_v61, 1  ;;  %v4568_v24 = vmov 0.0  }
  0x19   :  { %v4761_v19 = vsel %vm134_vm6, %v133_v4, %v132_v16  ;;  %v152_v20 = vsel %vm125_vm3, %v151_v9, %v150_v17  ;;  %4193 = vmatprep.subr.mxu1 %v4568_v24  ;;  %4203 = vmatprep.subr.mxu0 %v4568_v24  ;;  %vm4569_vm8 = vmmov 0   ;;  %vm255_vm9 = vcmask 64512  }
  0x1a   :  { %4190 = vmatprep.mubr.msk.f32.mxu1 %vm172_vm7, %v4761_v19  ;;  %v154_v21 = vsel %vm128_vm4, %v153_v12, %v152_v20  ;;  %4205 = vmatprep.mubr.msk.f32.mxu0 %vm4569_vm8, %v4568_v24  ;;  %vm925_vm10 = vcmask 130048   ;;  %vm927_vm11 = vcmask 195584   ;;  %vm1851_vm12 = vcmask 523264  }
  0x1b   :  { %v156_v22 = vsel %vm131_vm5, %v155_v15, %v154_v21  ;;  %vm3863_vm13 = vcmask 253952  }
  0x1c   :  { %v4768_v23 = vsel %vm134_vm6, %v157_v18, %v156_v22 }
  0x1d   :  { %4191 = vmatmul.mubr.msk.f32.vlgmr.msra.gmra.mxu1 %vm172_vm7, %v4768_v23 }
  0x1e   :  { %4195 = vmatprep.mubr.msk.f32.mxu1 %vm4569_vm8, %v4568_v24 }
  0xdd   :  { %v4192_v25 = vpop.f32.mrf.mxu1 }
  0xde   :  { %v4795_v29 = vadd.f32 %v4192_v25, %v3954_v26 }
  0xdf   :  { %v243_v27 = vpop.f32.mrf.mxu1 }
  0xe0   :  { %v4781_v28 = vadd.f32 %v3954_v26, %v243_v27 }
  0xe2   :  { %417 = vrot.lane.b32.xlu1 %v4781_v28, %s4570_s29  ;;  %253 = vrot.lane.b32.xlu0 %v4781_v28, %s4571_s30 }
  0xe6   :  { %584 = vrot.lane.b32.xlu1 %v4781_v28, %s4572_s16  ;;  %419 = vrot.lane.b32.xlu0 %v4781_v28, %s4573_s17 }
  0xea   :  { %749 = vrot.lane.b32.xlu1 %v4781_v28, %s4574_s18  ;;  %582 = vrot.lane.b32.xlu0 %v4781_v28, %s4575_s19 }
  0xee   :  { %930 = vrot.lane.b32.xlu1 %v4795_v29, %s4571_s30  ;;  %747 = vrot.lane.b32.xlu0 %v4781_v28, %s4576_s20 }
  0xf2   :  { %1093 = vrot.lane.b32.xlu1 %v4795_v29, %s4570_s29  ;;  %1095 = vrot.lane.b32.xlu0 %v4795_v29, %s4573_s17 }
  0xf6   :  { %1258 = vrot.lane.b32.xlu1 %v4795_v29, %s4575_s19  ;;  %1260 = vrot.lane.b32.xlu0 %v4795_v29, %s4572_s16 }
  0xfa   :  { %1423 = vrot.lane.b32.xlu1 %v4795_v29, %s4576_s20  ;;  %1425 = vrot.lane.b32.xlu0 %v4795_v29, %s4574_s18 }
  0xfe   :  { %506 = vrot.lane.b32.xlu1 %v4781_v28, %s5366_s21  ;;  %341 = vrot.lane.b32.xlu0 %v4781_v28, %s5368_s1 }
 0x154   :  { %v418_v30 = vpop.permute.xlu1 %417  ;;  %v254_v31 = vpop.permute.xlu0 %253 }
 0x155   :  { %4194 = vmatpush3.xpose.msk.msra.mxu1 %vm255_vm9, %v254_v31 }
 0x156   :  { %4198 = vmatprep.subr.mxu1 %v4568_v24 }
 0x158   :  { %v585_v32 = vpop.permute.xlu1 %584  ;;  %4196 = vmatmul.mubr.msk.f32.vlgmr.msra.gmra.mxu1 %vm255_vm9, %v4781_v28  ;;  %v420_v33 = vpop.permute.xlu0 %419 }
 0x159   :  { %4204 = vmatpush3.xpose.msk.msra.mxu0 %vm255_vm9, %v420_v33  ;;  %4200 = vmatprep.mubr.msk.f32.mxu1 %vm4569_vm8, %v4568_v24 }
 0x15a   :  { %4213 = vmatprep.subr.mxu0 %v4568_v24 }
 0x15c   :  { %v750_v34 = vpop.permute.xlu1 %749  ;;  %4206 = vmatmul.mubr.msk.f32.vlgmr.msra.gmra.mxu0 %vm255_vm9, %v418_v30  ;;  %v583_v35 = vpop.permute.xlu0 %582 }
 0x15d   :  { %4214 = vmatpush3.xpose.msk.msra.mxu0 %vm255_vm9, %v585_v32  ;;  %4215 = vmatprep.mubr.msk.f32.mxu0 %vm4569_vm8, %v4568_v24 }
 0x15e   :  { %4223 = vmatprep.subr.mxu0 %v4568_v24 }
 0x160   :  { %4216 = vmatmul.mubr.msk.f32.vlgmr.msra.gmra.mxu0 %vm255_vm9, %v583_v35  ;;  %v748_v36 = vpop.permute.xlu0 %747  ;;  %v931_v37 = vpop.permute.xlu1 %930 }
 0x161   :  { %4224 = vmatpush3.xpose.msk.msra.mxu0 %vm255_vm9, %v750_v34  ;;  %4225 = vmatprep.mubr.msk.f32.mxu0 %vm4569_vm8, %v4568_v24 }
 0x162   :  { %4233 = vmatprep.subr.mxu0 %v4568_v24 }
 0x164   :  { %4226 = vmatmul.mubr.msk.f32.vlgmr.msra.gmra.mxu0 %vm255_vm9, %v748_v36  ;;  %v1096_v38 = vpop.permute.xlu0 %1095  ;;  %v1094_v39 = vpop.permute.xlu1 %1093 }
 0x165   :  { %4234 = vmatpush3.xpose.msk.msra.mxu0 %vm255_vm9, %v931_v37  ;;  %4235 = vmatprep.mubr.msk.f32.mxu0 %vm4569_vm8, %v4568_v24 }
 0x166   :  { %4243 = vmatprep.subr.mxu0 %v4568_v24 }
 0x168   :  { %4236 = vmatmul.mubr.msk.f32.vlgmr.msra.gmra.mxu0 %vm255_vm9, %v4795_v29  ;;  %v1261_v40 = vpop.permute.xlu0 %1260  ;;  %v1259_v42 = vpop.permute.xlu1 %1258 }
 0x169   :  { %4244 = vmatpush3.xpose.msk.msra.mxu0 %vm255_vm9, %v1096_v38  ;;  %4245 = vmatprep.mubr.msk.f32.mxu0 %vm4569_vm8, %v4568_v24 }
 0x16a   :  { %4253 = vmatprep.subr.mxu0 %v4568_v24 }
 0x16c   :  { %4246 = vmatmul.mubr.msk.f32.vlgmr.msra.gmra.mxu0 %vm255_vm9, %v1094_v39  ;;  %v1426_v41 = vpop.permute.xlu0 %1425  ;;  %v1424_v44 = vpop.permute.xlu1 %1423 }
 0x16d   :  { %4254 = vmatpush3.xpose.msk.msra.mxu0 %vm255_vm9, %v1261_v40  ;;  %4255 = vmatprep.mubr.msk.f32.mxu0 %vm4569_vm8, %v4568_v24 }
 0x16e   :  { %4263 = vmatprep.subr.mxu0 %v4568_v24 }
 0x170   :  { %4256 = vmatmul.mubr.msk.f32.vlgmr.msra.gmra.mxu0 %vm255_vm9, %v1259_v42  ;;  %v342_v43 = vpop.permute.xlu0 %341  ;;  %v4882_v14 = vpop.permute.xlu1 %506 }
 0x171   :  { %4199 = vmatpush3.msra.mxu1 %v342_v43  ;;  %4264 = vmatpush3.xpose.msk.msra.mxu0 %vm255_vm9, %v1426_v41 }
 0x172   :  { %4265 = vmatprep.mubr.msk.f32.mxu0 %vm4569_vm8, %v4568_v24  ;;  %4208 = vmatprep.subr.mxu1 %v4568_v24 }
 0x174   :  { %4266 = vmatmul.mubr.msk.f32.vlgmr.msra.gmra.mxu0 %vm255_vm9, %v1424_v44 }
 0x218   :  { %v326_v46 = vpop.f32.mrf.mxu1 }
 0x219   :  { %v327_v47 = vadd.f32 %v326_v46, %v4860_v45 }
 0x21a   :  { %v4197_v48 = vpop.f32.mrf.mxu1 }
 0x21b   :  { %v330_v49 = vsel %vm255_vm9, %v327_v47, -inf }
 0x21c   :  { %331 = vmax.xlane.f32.xlu0 %v330_v49  ;;  %v491_v50 = vpop.f32.mrf.mxu0 }
 0x21d   :  { %v492_v51 = vadd.f32 %v491_v50, %v4860_v45 }
 0x21e   :  { %v4207_v52 = vpop.f32.mrf.mxu0 }
 0x21f   :  { %v495_v53 = vsel %vm255_vm9, %v492_v51, -inf }
 0x220   :  { %496 = vmax.xlane.f32.xlu1 %v495_v53  ;;  %v656_v54 = vpop.f32.mrf.mxu0 }
 0x221   :  { %v657_v55 = vadd.f32 %v656_v54, %v4860_v45 }
 0x222   :  { %v4217_v56 = vpop.f32.mrf.mxu0 }
 0x223   :  { %v660_v57 = vsel %vm255_vm9, %v657_v55, -inf }
 0x224   :  { %661 = vmax.xlane.f32.xlu0 %v660_v57  ;;  %v821_v58 = vpop.f32.mrf.mxu0 }
 0x225   :  { %v822_v59 = vadd.f32 %v821_v58, %v4860_v45 }
 0x226   :  { %v4227_v60 = vpop.f32.mrf.mxu0 }
 0x227   :  { %v825_v61 = vsel %vm255_vm9, %v822_v59, -inf }
 0x228   :  { %826 = vmax.xlane.f32.xlu0 %v825_v61  ;;  %v1002_v62 = vpop.f32.mrf.mxu0 }
 0x229   :  { %v1003_v63 = vadd.f32 %v1002_v62, %v4860_v45 }
 0x22a   :  { %v4237_v0 = vpop.f32.mrf.mxu0 }
 0x22b   :  { %v1006_v1 = vsel %vm255_vm9, %v1003_v63, -inf }
 0x22c   :  { %1007 = vmax.xlane.f32.xlu1 %v1006_v1  ;;  %v1167_v2 = vpop.f32.mrf.mxu0 }
 0x22d   :  { %v1168_v3 = vadd.f32 %v1167_v2, %v4860_v45 }
 0x22e   :  { %v4247_v4 = vpop.f32.mrf.mxu0 }
 0x22f   :  { %v1171_v5 = vsel %vm255_vm9, %v1168_v3, -inf }
 0x230   :  { %1172 = vmax.xlane.f32.xlu0 %v1171_v5  ;;  %v1332_v6 = vpop.f32.mrf.mxu0 }
 0x231   :  { %v1333_v7 = vadd.f32 %v1332_v6, %v4860_v45 }
 0x232   :  { %v4257_v8 = vpop.f32.mrf.mxu0 }
 0x233   :  { %v1336_v9 = vsel %vm255_vm9, %v1333_v7, -inf }
 0x234   :  { %1337 = vmax.xlane.f32.xlu1 %v1336_v9  ;;  %v1497_v10 = vpop.f32.mrf.mxu0 }
 0x235   :  { %v1498_v11 = vadd.f32 %v1497_v10, %v4860_v45 }
 0x236   :  { %v4267_v12 = vpop.f32.mrf.mxu0 }
 0x237   :  { %v1501_v13 = vsel %vm255_vm9, %v1498_v11, -inf }
 0x238   :  { %1502 = vmax.xlane.f32.xlu0 %v1501_v13 }
 0x245   :  { %836 = vrot.lane.b32.xlu1 %v4781_v28, %s5364_s2 }
 0x24e   :  { %671 = vrot.lane.b32.xlu0 %v4781_v28, %s5362_s24 }
 0x2a5   :  { %v332_v15 = vpop.xlane.xlu0 %331 }
 0x2a6   :  { %v333_v16 = vsub.f32 %v327_v47, %v332_v15 }
 0x2a8   :  { %v334_v17 = vmul.f32 1.442695, %v333_v16 }
 0x2a9   :  { %v497_v18 = vpop.xlane.xlu1 %496 }
 0x2aa   :  { %4466 = vpow2.f32 %v334_v17  ;;  %v498_v20 = vsub.f32 %v492_v51, %v497_v18 }
 0x2ac   :  { %v499_v21 = vmul.f32 1.442695, %v498_v20 }
 0x2ad   :  { %v662_v22 = vpop.xlane.xlu0 %661 }
 0x2ae   :  { %4468 = vpow2.f32 %v499_v21  ;;  %v663_v25 = vsub.f32 %v657_v55, %v662_v22 }
 0x2b0   :  { %v664_v26 = vmul.f32 1.442695, %v663_v25 }
 0x2b1   :  { %v827_v27 = vpop.xlane.xlu0 %826 }
 0x2b2   :  { %4470 = vpow2.f32 %v664_v26  ;;  %v828_v30 = vsub.f32 %v822_v59, %v827_v27 }
 0x2b4   :  { %v829_v31 = vmul.f32 1.442695, %v828_v30 }
 0x2b5   :  { %v1008_v39 = vpop.xlane.xlu1 %1007 }
 0x2b6   :  { %4472 = vpow2.f32 %v829_v31  ;;  %v1009_v40 = vsub.f32 %v1003_v63, %v1008_v39  ;;  %v1604_v39 = vld [vmem:[%s5351_s5 + $0x8] sm:$0xff] }
 0x2b7   :  { %v4467_v32 = vpop.eup %4466 }
 0x2b8   :  { %v336_v28 = vsel %vm255_vm9, %v4467_v32, 0.0  ;;  %v1010_v44 = vmul.f32 1.442695, %v1009_v40  ;;  %v1603_v40 = vld [vmem:[%s5351_s5] sm:$0xff] }
 0x2b9   :  { %337 = vadd.xlane.f32.xlu1 %v336_v28  ;;  %v1173_v41 = vpop.xlane.xlu0 %1172 }
 0x2ba   :  { %v1174_v43 = vsub.f32 %v1168_v3, %v1173_v41  ;;  %4474 = vpow2.f32 %v1010_v44 }
 0x2bb   :  { %v4469_v33 = vpop.eup %4468 }
 0x2bc   :  { %v501_v34 = vsel %vm255_vm9, %v4469_v33, 0.0  ;;  %v1175_v48 = vmul.f32 1.442695, %v1174_v43 }
 0x2bd   :  { %502 = vadd.xlane.f32.xlu0 %v501_v34  ;;  %v1338_v42 = vpop.xlane.xlu1 %1337 }
 0x2be   :  { %v1339_v46 = vsub.f32 %v1333_v7, %v1338_v42  ;;  %4476 = vpow2.f32 %v1175_v48 }
 0x2bf   :  { %v4471_v35 = vpop.eup %4470 }
 0x2c0   :  { %v666_v36 = vsel %vm255_vm9, %v4471_v35, 0.0  ;;  %v1340_v49 = vmul.f32 1.442695, %v1339_v46 }
 0x2c1   :  { %667 = vadd.xlane.f32.xlu1 %v666_v36  ;;  %v1503_v47 = vpop.xlane.xlu0 %1502  ;;  %v837_v60 = vpop.permute.xlu1 %836 }
 0x2c2   :  { %v1504_v50 = vsub.f32 %v1498_v11, %v1503_v47  ;;  %4478 = vpow2.f32 %v1340_v49 }
 0x2c3   :  { %v4887_v37 = vpop.eup %4472 }
 0x2c4   :  { %v831_v38 = vsel %vm255_vm9, %v4887_v37, 0.0  ;;  %v1505_v51 = vmul.f32 1.442695, %v1504_v50 }
 0x2c5   :  { %832 = vadd.xlane.f32.xlu0 %v831_v38  ;;  %v672_v61 = vpop.permute.xlu0 %671  ;;  %v1605_v38 = vld [vmem:[%s5351_s5 + $0x10] sm:$0xff] }
 0x2c6   :  { %4480 = vpow2.f32 %v1505_v51 }
 0x2c7   :  { %v4475_v52 = vpop.eup %4474 }
 0x2c8   :  { %v1012_v54 = vsel %vm255_vm9, %v4475_v52, 0.0 }
 0x2cb   :  { %v4895_v53 = vpop.eup %4476 }
 0x2cc   :  { %v1177_v57 = vsel %vm255_vm9, %v4895_v53, 0.0 }
 0x2cf   :  { %v4898_v55 = vpop.eup %4478 }
 0x2d0   :  { %v1342_v56 = vsel %vm255_vm9, %v4898_v55, 0.0 }
 0x2d2   :  { %1182 = vrot.lane.b32.xlu1 %v4795_v29, %s5366_s21 }
 0x2d3   :  { %v4904_v58 = vpop.eup %4480 }
 0x2d4   :  { %v1507_v59 = vsel %vm255_vm9, %v4904_v58, 0.0 }
 0x2db   :  { %1017 = vrot.lane.b32.xlu0 %v4795_v29, %s5368_s1 }
 0x2f6   :  { %1013 = vadd.xlane.f32.xlu1 %v1012_v54 }
 0x2fa   :  { %1343 = vadd.xlane.f32.xlu1 %v1342_v56  ;;  %1178 = vadd.xlane.f32.xlu0 %v1177_v57 }
 0x2fe   :  { %1508 = vadd.xlane.f32.xlu1 %v1507_v59 }
 0x30f   :  { %1512 = vrot.lane.b32.xlu1 %v4795_v29, %s5364_s2 }
 0x310   :  { %1347 = vrot.lane.b32.xlu0 %v4795_v29, %s5362_s24 }
 0x342   :  { %v338_v62 = vpop.xlane.xlu1 %337 }
 0x343   :  { %4482 = vrcp.f32 %v338_v62  ;;  %v3981_v62 = vld [vmem:[%s5352_s6] ss:$0 sm:$0xff] }
 0x346   :  { %v503_v63 = vpop.xlane.xlu0 %502 }
 0x347   :  { %4484 = vrcp.f32 %v503_v63 }
 0x34a   :  { %v668_v0 = vpop.xlane.xlu1 %667 }
 0x34b   :  { %4486 = vrcp.f32 %v668_v0 }
 0x34e   :  { %v833_v1 = vpop.xlane.xlu0 %832  ;;  %v1183_v10 = vpop.permute.xlu1 %1182 }
 0x34f   :  { %4488 = vrcp.f32 %v833_v1 }
 0x350   :  { %v4483_v2 = vpop.eup %4482 }
 0x351   :  { %v340_v3 = vmul.f32 %v4483_v2, %v4467_v32 }
 0x352   :  { %v1018_v9 = vpop.permute.xlu0 %1017 }
 0x353   :  { %4201 = vmatmul.mubr.msk.f32.vlgmr.msra.gmra.mxu1 %vm255_vm9, %v340_v3 }
 0x354   :  { %v4485_v4 = vpop.eup %4484  ;;  %4209 = vmatpush3.msra.mxu1 %v4882_v14  ;;  %4210 = vmatprep.mubr.msk.f32.mxu1 %vm4569_vm8, %v4568_v24 }
 0x355   :  { %4218 = vmatprep.subr.mxu1 %v4568_v24  ;;  %v505_v29 = vmul.f32 %v4485_v4, %v4469_v33 }
 0x357   :  { %4211 = vmatmul.mubr.msk.f32.vlgmr.msra.gmra.mxu1 %vm255_vm9, %v505_v29 }
 0x358   :  { %v4487_v5 = vpop.eup %4486  ;;  %4219 = vmatpush3.msra.mxu1 %v672_v61  ;;  %4220 = vmatprep.mubr.msk.f32.mxu1 %vm4569_vm8, %v4568_v24 }
 0x359   :  { %4228 = vmatprep.subr.mxu1 %v4568_v24  ;;  %v670_v6 = vmul.f32 %v4487_v5, %v4471_v35 }
 0x35b   :  { %4221 = vmatmul.mubr.msk.f32.vlgmr.msra.gmra.mxu1 %vm255_vm9, %v670_v6 }
 0x35c   :  { %v4489_v7 = vpop.eup %4488  ;;  %4229 = vmatpush3.msra.mxu1 %v837_v60  ;;  %4230 = vmatprep.mubr.msk.f32.mxu1 %vm4569_vm8, %v4568_v24 }
 0x35d   :  { %4238 = vmatprep.subr.mxu1 %v4568_v24  ;;  %v835_v8 = vmul.f32 %v4489_v7, %v4887_v37  ;;  %v1606_v37 = vld [vmem:[%s5351_s5 + $0x18] sm:$0xff] }
 0x35e   :  { %4273 = vmatprep.subr.mxu0 %v1606_v37 }
 0x35f   :  { %4231 = vmatmul.mubr.msk.f32.vlgmr.msra.gmra.mxu1 %vm255_vm9, %v835_v8  ;;  %4274 = vmatpush3.msra.mxu0 %v1606_v37 }
 0x360   :  { %4239 = vmatpush3.msra.mxu1 %v1018_v9  ;;  %4240 = vmatprep.mubr.msk.f32.mxu1 %vm4569_vm8, %v4568_v24 }
 0x361   :  { %4248 = vmatprep.subr.mxu1 %v4568_v24  ;;  %4275 = vmatprep.subr.mxu0 %v1605_v38 }
 0x362   :  { %4276 = vmatpush3.msra.mxu0 %v1605_v38 }
 0x363   :  { %4277 = vmatprep.subr.mxu0 %v1604_v39 }
 0x364   :  { %4278 = vmatpush3.msra.mxu0 %v1604_v39 }
 0x365   :  { %4279 = vmatprep.subr.mxu0 %v1603_v40 }
 0x366   :  { %4280 = vmatpush3.msra.mxu0 %v1603_v40 }
 0x37f   :  { %v1014_v11 = vpop.xlane.xlu1 %1013 }
 0x380   :  { %4490 = vrcp.f32 %v1014_v11 }
 0x383   :  { %v1344_v12 = vpop.xlane.xlu1 %1343  ;;  %v1179_v13 = vpop.xlane.xlu0 %1178 }
 0x384   :  { %4492 = vrcp.f32 %v1179_v13 }
 0x385   :  { %4494 = vrcp.f32 %v1344_v12 }
 0x387   :  { %v1509_v14 = vpop.xlane.xlu1 %1508  ;;  %v1348_v21 = vpop.permute.xlu0 %1347 }
 0x388   :  { %4496 = vrcp.f32 %v1509_v14 }
 0x38b   :  { %v1513_v26 = vpop.permute.xlu1 %1512 }
 0x38d   :  { %v4491_v15 = vpop.eup %4490 }
 0x38e   :  { %v1016_v16 = vmul.f32 %v4491_v15, %v4475_v52  ;;  %v1744_v15 = vld [vmem:[%s5353_s7 + $0x10] sm:$0xff] }
 0x390   :  { %4241 = vmatmul.mubr.msk.f32.vlgmr.msra.gmra.mxu1 %vm255_vm9, %v1016_v16  ;;  %v1743_v16 = vld [vmem:[%s5353_s7 + $0x8] sm:$0xff] }
 0x391   :  { %4249 = vmatpush3.msra.mxu1 %v1183_v10  ;;  %4250 = vmatprep.mubr.msk.f32.mxu1 %vm4569_vm8, %v4568_v24  ;;  %v4493_v17 = vpop.eup %4492 }
 0x392   :  { %4258 = vmatprep.subr.mxu1 %v4568_v24  ;;  %v1181_v18 = vmul.f32 %v4493_v17, %v4895_v53  ;;  %v4495_v20 = vpop.eup %4494  ;;  %v1742_v17 = vld [vmem:[%s5353_s7] sm:$0xff] }
 0x393   :  { %v1346_v22 = vmul.f32 %v4495_v20, %v4898_v55  ;;  %v1842_v20 = vld [vmem:[%s5355_s9 + $0x30] sm:$0xff] }
 0x394   :  { %4251 = vmatmul.mubr.msk.f32.vlgmr.msra.gmra.mxu1 %vm255_vm9, %v1181_v18  ;;  %v1843_v18 = vld [vmem:[%s5355_s9 + $0x38] sm:$0xff] }
 0x395   :  { %4259 = vmatpush3.msra.mxu1 %v1348_v21  ;;  %4260 = vmatprep.mubr.msk.f32.mxu1 %vm4569_vm8, %v4568_v24  ;;  %v4497_v25 = vpop.eup %4496  ;;  %v1841_v21 = vld [vmem:[%s5355_s9 + $0x28] sm:$0xff] }
 0x396   :  { %4268 = vmatprep.subr.mxu1 %v4568_v24  ;;  %v1511_v27 = vmul.f32 %v4497_v25, %v4904_v58  ;;  %4295 = vmatprep.subr.mxu0 %v1843_v18 }
 0x398   :  { %4261 = vmatmul.mubr.msk.f32.vlgmr.msra.gmra.mxu1 %vm255_vm9, %v1346_v22  ;;  %v1840_v22 = vld [vmem:[%s5355_s9 + $0x20] sm:$0xff] }
 0x399   :  { %4269 = vmatpush3.msra.mxu1 %v1513_v26  ;;  %4270 = vmatprep.mubr.msk.f32.mxu1 %vm4569_vm8, %v4568_v24 }
 0x39c   :  { %4271 = vmatmul.mubr.msk.f32.vlgmr.msra.gmra.mxu1 %vm255_vm9, %v1511_v27 }
 0x413   :  { %v413_v30 = vpop.f32.mrf.mxu1 }
 0x415   :  { %v4202_v31 = vpop.f32.mrf.mxu1 }
 0x417   :  { %v578_v32 = vpop.f32.mrf.mxu1 }
 0x418   :  { %913 = vrot.lane.b32.xlu0 %v578_v32, %s4581_s25 }
 0x419   :  { %v4212_v28 = vpop.f32.mrf.mxu1 }
 0x41b   :  { %v743_v33 = vpop.f32.mrf.mxu1 }
 0x41c   :  { %917 = vrot.lane.b32.xlu1 %v743_v33, %s4582_s26  ;;  %v3984_v33 = vld [vmem:[%s5357_s11] ss:$0 sm:$0xff] }
 0x41d   :  { %v4222_v34 = vpop.f32.mrf.mxu1 }
 0x41f   :  { %v908_v35 = vpop.f32.mrf.mxu1 }
 0x420   :  { %921 = vrot.lane.b32.xlu1 %v908_v35, %s4583_s27  ;;  %v3985_v35 = vld [vmem:[%s5358_s12] ss:$0 sm:$0xff] }
 0x421   :  { %v4232_v36 = vpop.f32.mrf.mxu1 }
 0x450   :  { %v1089_v41 = vpop.f32.mrf.mxu1 }
 0x452   :  { %v4242_v42 = vpop.f32.mrf.mxu1 }
 0x453   :  { %v1839_v42 = vld [vmem:[%s5355_s9 + $0x18] sm:$0xff] }
 0x454   :  { %v1254_v43 = vpop.f32.mrf.mxu1 }
 0x455   :  { %1589 = vrot.lane.b32.xlu0 %v1254_v43, %s4581_s25  ;;  %v1838_v43 = vld [vmem:[%s5355_s9 + $0x10] sm:$0xff] }
 0x456   :  { %v4252_v44 = vpop.f32.mrf.mxu1 }
 0x457   :  { %v1837_v44 = vld [vmem:[%s5355_s9 + $0x8] sm:$0xff] }
 0x458   :  { %v1419_v46 = vpop.f32.mrf.mxu1 }
 0x459   :  { %1593 = vrot.lane.b32.xlu0 %v1419_v46, %s4582_s26  ;;  %v1836_v46 = vld [vmem:[%s5355_s9] sm:$0xff] }
 0x45a   :  { %v4262_v47 = vpop.f32.mrf.mxu1 }
 0x45b   :  { %v3986_v47 = vld [vmem:[%s5354_s8] ss:$0 sm:$0xff] }
 0x45c   :  { %v1584_v48 = vpop.f32.mrf.mxu1 }
 0x45d   :  { %1597 = vrot.lane.b32.xlu1 %v1584_v48, %s4583_s27 }
 0x45e   :  { %v4272_v49 = vpop.f32.mrf.mxu1 }
 0x48a   :  { %v914_v50 = vpop.permute.xlu0 %913 }
 0x48b   :  { %v924_v52 = vsel %vm255_vm9, %v413_v30, %v914_v50 }
 0x48e   :  { %v918_v51 = vpop.permute.xlu1 %917 }
 0x48f   :  { %v926_v53 = vsel %vm925_vm10, %v924_v52, %v918_v51 }
 0x492   :  { %v922_v54 = vpop.permute.xlu1 %921 }
 0x493   :  { %v928_v55 = vsel %vm927_vm11, %v926_v53, %v922_v54  ;;  %v3989_v54 = vld [vmem:[%s5356_s10] ss:$0 sm:$0xff] }
 0x494   :  { %4281 = vmatprep.mubr.msk.f32.mxu0 %vm172_vm7, %v928_v55 }
 0x4c7   :  { %v1590_v56 = vpop.permute.xlu0 %1589 }
 0x4c8   :  { %v1600_v58 = vsel %vm255_vm9, %v1089_v41, %v1590_v56 }
 0x4cb   :  { %v1594_v57 = vpop.permute.xlu0 %1593 }
 0x4cc   :  { %v1601_v59 = vsel %vm925_vm10, %v1600_v58, %v1594_v57 }
 0x4cf   :  { %v1598_v60 = vpop.permute.xlu1 %1597 }
 0x4d0   :  { %v1602_v61 = vsel %vm927_vm11, %v1601_v59, %v1598_v60 }
 0x4d1   :  { %4282 = vmatmul.mubr.msk.f32.vlgmr.msra.gmra.mxu0 %vm172_vm7, %v1602_v61 }
 0x4d2   :  { %4296 = vmatpush3.msra.mxu0 %v1843_v18 }
 0x4d3   :  { %4297 = vmatprep.subr.mxu0 %v1842_v20 }
 0x4d4   :  { %4298 = vmatpush3.msra.mxu0 %v1842_v20 }
 0x4d5   :  { %4299 = vmatprep.subr.mxu0 %v1841_v21 }
 0x4d6   :  { %4300 = vmatpush3.msra.mxu0 %v1841_v21 }
 0x4d7   :  { %4301 = vmatprep.subr.mxu0 %v1840_v22 }
 0x4d8   :  { %4302 = vmatpush3.msra.mxu0 %v1840_v22 }
 0x4d9   :  { %4303 = vmatprep.subr.mxu0 %v1839_v42 }
 0x4da   :  { %4304 = vmatpush3.msra.mxu0 %v1839_v42 }
 0x4db   :  { %4305 = vmatprep.subr.mxu0 %v1838_v43 }
 0x4dc   :  { %4306 = vmatpush3.msra.mxu0 %v1838_v43 }
 0x4dd   :  { %4307 = vmatprep.subr.mxu0 %v1837_v44 }
 0x4de   :  { %4308 = vmatpush3.msra.mxu0 %v1837_v44 }
 0x4df   :  { %4309 = vmatprep.subr.mxu0 %v1836_v46 }
 0x4e0   :  { %4310 = vmatpush3.msra.mxu0 %v1836_v46 }
 0x4e1   :  { %4335 = vmatprep.subr.mxu0 %v4568_v24 }
 0x591   :  { %v4283_v63 = vpop.f32.mrf.mxu0 }
 0x592   :  { %v1692_v0 = vadd.f32 %v4283_v63, %v3981_v62 }
 0x593   :  { %v1686_v1 = vpop.f32.mrf.mxu0 }
 0x594   :  { %v1687_v2 = vadd.f32 %v3981_v62, %v1686_v1  ;;  %v1696_v3 = vadd.f32 %v1692_v0, %v4768_v23 }
 0x596   :  { %v1702_v4 = vsel %vm172_vm7, %v1696_v3, 0.0  ;;  %v1695_v29 = vadd.f32 %v1687_v2, %v4761_v19  ;;  %v1745_v19 = vld [vmem:[%s5353_s7 + $0x18] sm:$0xff] }
 0x597   :  { %1703 = vadd.xlane.f32.xlu1 %v1702_v4  ;;  %4284 = vmatprep.subr.mxu1 %v1745_v19 }
 0x598   :  { %v1699_v5 = vsel %vm172_vm7, %v1695_v29, 0.0  ;;  %4285 = vmatpush3.msra.mxu1 %v1745_v19 }
 0x599   :  { %1700 = vadd.xlane.f32.xlu0 %v1699_v5  ;;  %4286 = vmatprep.subr.mxu1 %v1744_v15 }
 0x59a   :  { %4287 = vmatpush3.msra.mxu1 %v1744_v15 }
 0x59b   :  { %4288 = vmatprep.subr.mxu1 %v1743_v16 }
 0x59c   :  { %4289 = vmatpush3.msra.mxu1 %v1743_v16 }
 0x59d   :  { %4290 = vmatprep.subr.mxu1 %v1742_v17 }
 0x59e   :  { %4291 = vmatpush3.msra.mxu1 %v1742_v17  ;;  %v3992_v17 = vld [vmem:[%s5359_s13] ss:$0 sm:$0xff] }
 0x620   :  { %v1704_v6 = vpop.xlane.xlu1 %1703 }
 0x621   :  { %v1707_v7 = vmul.f32 0.03125, %v1704_v6 }
 0x622   :  { %v1701_v8 = vpop.xlane.xlu0 %1700 }
 0x623   :  { %v1706_v9 = vmul.f32 0.03125, %v1701_v8  ;;  %v1709_v10 = vsub.f32 %v1696_v3, %v1707_v7  ;;  %v3997_v8 = vld [vmem:[%s5349_s3 + $0x38] sm:$0xff] }
 0x624   :  { %4314 = vmatprep.subr.mxu1 %v3997_v8 }
 0x625   :  { %v1708_v11 = vsub.f32 %v1695_v29, %v1706_v9  ;;  %v1711_v14 = vmul.f32 %v1709_v10, %v1709_v10  ;;  %v3996_v9 = vld [vmem:[%s5349_s3 + $0x30] sm:$0xff] }
 0x627   :  { %v1710_v12 = vmul.f32 %v1708_v11, %v1708_v11  ;;  %v1715_v23 = vsel %vm172_vm7, %v1711_v14, 0.0 }
 0x629   :  { %v1712_v13 = vsel %vm172_vm7, %v1710_v12, 0.0 }
 0x62a   :  { %1713 = vadd.xlane.f32.xlu0 %v1712_v13 }
 0x62e   :  { %1716 = vadd.xlane.f32.xlu0 %v1715_v23 }
 0x6b3   :  { %v1714_v25 = vpop.xlane.xlu0 %1713 }
 0x6b4   :  { %v1718_v26 = vmul.f32 0.03125, %v1714_v25  ;;  %v3993_v25 = vld [vmem:[%s5360_s14] ss:$0 sm:$0xff] }
 0x6b6   :  { %v1720_v27 = vadd.f32 1e-05, %v1718_v26 }
 0x6b7   :  { %v1717_v30 = vpop.xlane.xlu0 %1716 }
 0x6b8   :  { %4498 = vrsqrt.f32 %v1720_v27  ;;  %v1719_v31 = vmul.f32 0.03125, %v1717_v30 }
 0x6ba   :  { %v1721_v32 = vadd.f32 1e-05, %v1719_v31 }
 0x6bc   :  { %4500 = vrsqrt.f32 %v1721_v32  ;;  %v3999_v32 = vld [vmem:[%s5350_s4 + $0x1] ss:$0 sm:$0xff]  ;;  %s5370_s4 = smov 64  }
 0x6c5   :  { %v4499_v28 = vpop.eup %4498 }
 0x6c6   :  { %v1724_v34 = vmul.f32 %v4499_v28, %v1708_v11  ;;  %v3994_v11 = vld [vmem:[%s5349_s3 + $0x20] sm:$0xff] }
 0x6c8   :  { %v1732_v36 = vmul.f32 %v3984_v33, %v1724_v34 }
 0x6c9   :  { %v4501_v37 = vpop.eup %4500 }
 0x6ca   :  { %v1725_v38 = vmul.f32 %v4501_v37, %v1709_v10  ;;  %v1740_v39 = vadd.f32 %v3985_v35, %v1732_v36  ;;  %v3995_v10 = vld [vmem:[%s5349_s3 + $0x28] sm:$0xff] }
 0x6cc   :  { %v1733_v40 = vmul.f32 %v3984_v33, %v1725_v38  ;;  %4292 = vmatprep.mubr.msk.f32.mxu1 %vm172_vm7, %v1740_v39 }
 0x6ce   :  { %v1741_v41 = vadd.f32 %v3985_v35, %v1733_v40 }
 0x6d0   :  { %4293 = vmatmul.mubr.msk.f32.vlgmr.msra.gmra.mxu1 %vm172_vm7, %v1741_v41 }
 0x6d1   :  { %4315 = vmatpush3.msra.mxu1 %v3997_v8 }
 0x6d2   :  { %4316 = vmatprep.subr.mxu1 %v3996_v9 }
 0x6d3   :  { %4317 = vmatpush3.msra.mxu1 %v3996_v9 }
 0x6d4   :  { %4318 = vmatprep.subr.mxu1 %v3995_v10 }
 0x6d5   :  { %4319 = vmatpush3.msra.mxu1 %v3995_v10 }
 0x6d6   :  { %4320 = vmatprep.subr.mxu1 %v3994_v11 }
 0x6d7   :  { %4321 = vmatpush3.msra.mxu1 %v3994_v11 }
 0x6d8   :  { %4325 = vmatprep.subr.mxu1 %v4568_v24 }
 0x790   :  { %v4294_v48 = vpop.f32.mrf.mxu1 }
 0x791   :  { %v1831_v49 = vadd.f32 %v4294_v48, %v3986_v47 }
 0x792   :  { %v1825_v50 = vpop.f32.mrf.mxu1 }
 0x793   :  { %v1826_v51 = vadd.f32 %v3986_v47, %v1825_v50  ;;  %v1835_v53 = vmax.f32 %v1831_v49, 0.0 }
 0x795   :  { %v1834_v52 = vmax.f32 %v1826_v51, 0.0 }
 0x797   :  { %4311 = vmatprep.mubr.msk.f32.mxu0 %vm1851_vm12, %v1834_v52 }
 0x798   :  { %4312 = vmatmul.mubr.msk.f32.vlgmr.msra.gmra.mxu0 %vm1851_vm12, %v1835_v53 }
 0x799   :  { %4337 = vmatprep.mubr.msk.f32.mxu0 %vm4569_vm8, %v4568_v24 }
 0x858   :  { %v4313_v55 = vpop.f32.mrf.mxu0 }
 0x859   :  { %v1930_v56 = vadd.f32 %v4313_v55, %v3989_v54 }
 0x85a   :  { %v1924_v57 = vpop.f32.mrf.mxu0 }
 0x85b   :  { %v1925_v58 = vadd.f32 %v3989_v54, %v1924_v57  ;;  %v1934_v59 = vadd.f32 %v1930_v56, %v1741_v41 }
 0x85d   :  { %v1940_v60 = vsel %vm172_vm7, %v1934_v59, 0.0  ;;  %v1933_v61 = vadd.f32 %v1925_v58, %v1740_v39 }
 0x85e   :  { %1941 = vadd.xlane.f32.xlu0 %v1940_v60 }
 0x85f   :  { %v1937_v62 = vsel %vm172_vm7, %v1933_v61, 0.0 }
 0x860   :  { %1938 = vadd.xlane.f32.xlu1 %v1937_v62 }
 0x8e7   :  { %v1942_v63 = vpop.xlane.xlu0 %1941 }
 0x8e8   :  { %v1944_v0 = vmul.f32 0.03125, %v1942_v63 }
 0x8e9   :  { %v1939_v1 = vpop.xlane.xlu1 %1938 }
 0x8ea   :  { %v1946_v2 = vsub.f32 %v1934_v59, %v1944_v0  ;;  %v1943_v3 = vmul.f32 0.03125, %v1939_v1 }
 0x8ec   :  { %v1945_v4 = vsub.f32 %v1933_v61, %v1943_v3  ;;  %v1948_v29 = vmul.f32 %v1946_v2, %v1946_v2 }
 0x8ee   :  { %v1952_v5 = vsel %vm172_vm7, %v1948_v29, 0.0  ;;  %v1947_v6 = vmul.f32 %v1945_v4, %v1945_v4 }
 0x8ef   :  { %1953 = vadd.xlane.f32.xlu0 %v1952_v5 }
 0x8f0   :  { %v1949_v7 = vsel %vm172_vm7, %v1947_v6, 0.0 }
 0x8f1   :  { %1950 = vadd.xlane.f32.xlu1 %v1949_v7 }
 0x978   :  { %v1954_v12 = vpop.xlane.xlu0 %1953 }
 0x979   :  { %v1956_v13 = vmul.f32 0.03125, %v1954_v12 }
 0x97a   :  { %v1951_v14 = vpop.xlane.xlu1 %1950 }
 0x97b   :  { %v1958_v23 = vadd.f32 1e-05, %v1956_v13  ;;  %v1955_v19 = vmul.f32 0.03125, %v1951_v14 }
 0x97d   :  { %4502 = vrsqrt.f32 %v1958_v23  ;;  %v1957_v15 = vadd.f32 1e-05, %v1955_v19 }
 0x97f   :  { %4504 = vrsqrt.f32 %v1957_v15 }
 0x98a   :  { %v4503_v16 = vpop.eup %4502 }
 0x98b   :  { %v1962_v18 = vmul.f32 %v4503_v16, %v1946_v2 }
 0x98c   :  { %v4505_v20 = vpop.eup %4504 }
 0x98d   :  { %v1961_v21 = vmul.f32 %v4505_v20, %v1945_v4  ;;  %v1970_v22 = vmul.f32 %v3992_v17, %v1962_v18 }
 0x98f   :  { %v1969_v26 = vmul.f32 %v3992_v17, %v1961_v21  ;;  %v5060_v30 = vadd.f32 %v3993_v25, %v1970_v22 }
 0x991   :  { %v5058_v27 = vadd.f32 %v3993_v25, %v1969_v26 }
 0x993   :  { %4322 = vmatprep.mubr.msk.f32.mxu1 %vm172_vm7, %v5058_v27 }
 0x994   :  { %4323 = vmatmul.mubr.msk.f32.vlgmr.msra.gmra.mxu1 %vm172_vm7, %v5060_v30 }
 0x995   :  { %4327 = vmatprep.mubr.msk.f32.mxu1 %vm4569_vm8, %v4568_v24 }
 0xa54   :  { %v4324_v31 = vpop.f32.mrf.mxu1 }
 0xa55   :  { %v5085_v34 = vadd.f32 %v4324_v31, %v3999_v32 }
 0xa56   :  { %v2064_v28 = vpop.f32.mrf.mxu1 }
 0xa57   :  { %v5071_v33 = vadd.f32 %v3999_v32, %v2064_v28 }
 0xa59   :  { %2239 = vrot.lane.b32.xlu0 %v5071_v33, %s4573_s17  ;;  %2074 = vrot.lane.b32.xlu1 %v5071_v33, %s4571_s30 }
 0xa5d   :  { %2402 = vrot.lane.b32.xlu0 %v5071_v33, %s4575_s19  ;;  %2237 = vrot.lane.b32.xlu1 %v5071_v33, %s4570_s29 }
 0xa61   :  { %2567 = vrot.lane.b32.xlu0 %v5071_v33, %s4576_s20  ;;  %2404 = vrot.lane.b32.xlu1 %v5071_v33, %s4572_s16 }
 0xa65   :  { %2913 = vrot.lane.b32.xlu0 %v5085_v34, %s4573_s17  ;;  %2569 = vrot.lane.b32.xlu1 %v5071_v33, %s4574_s18  ;;  %s5371_s17 = smov 56  }
 0xa69   :  { %3078 = vrot.lane.b32.xlu0 %v5085_v34, %s4572_s16  ;;  %2748 = vrot.lane.b32.xlu1 %v5085_v34, %s4571_s30  ;;  %s5373_s30 = smov 48  }
 0xa6d   :  { %3243 = vrot.lane.b32.xlu0 %v5085_v34, %s4574_s18  ;;  %2911 = vrot.lane.b32.xlu1 %v5085_v34, %s4570_s29  ;;  %s5372_s29 = smov 40  }
 0xa71   :  { %2161 = vrot.lane.b32.xlu0 %v5071_v33, %s5370_s4  ;;  %3076 = vrot.lane.b32.xlu1 %v5085_v34, %s4575_s19 }
 0xa75   :  { %3241 = vrot.lane.b32.xlu1 %v5085_v34, %s4576_s20 }
 0xa79   :  { %2326 = vrot.lane.b32.xlu1 %v5071_v33, %s5371_s17 }
 0xacb   :  { %v2240_v35 = vpop.permute.xlu0 %2239  ;;  %v2075_v36 = vpop.permute.xlu1 %2074 }
 0xacc   :  { %4326 = vmatpush3.xpose.msk.msra.mxu1 %vm255_vm9, %v2075_v36  ;;  %4336 = vmatpush3.xpose.msk.msra.mxu0 %vm255_vm9, %v2240_v35 }
 0xacd   :  { %4345 = vmatprep.subr.mxu0 %v4568_v24  ;;  %4330 = vmatprep.subr.mxu1 %v4568_v24 }
 0xacf   :  { %v2403_v37 = vpop.permute.xlu0 %2402  ;;  %4328 = vmatmul.mubr.msk.f32.vlgmr.msra.gmra.mxu1 %vm255_vm9, %v5071_v33  ;;  %v2238_v38 = vpop.permute.xlu1 %2237 }
 0xad0   :  { %4338 = vmatmul.mubr.msk.f32.vlgmr.msra.gmra.mxu0 %vm255_vm9, %v2238_v38  ;;  %4332 = vmatprep.mubr.msk.f32.mxu1 %vm4569_vm8, %v4568_v24 }
 0xad1   :  { %4347 = vmatprep.mubr.msk.f32.mxu0 %vm4569_vm8, %v4568_v24 }
 0xad3   :  { %v2568_v39 = vpop.permute.xlu0 %2567  ;;  %v2405_v40 = vpop.permute.xlu1 %2404 }
 0xad4   :  { %4346 = vmatpush3.xpose.msk.msra.mxu0 %vm255_vm9, %v2405_v40 }
 0xad5   :  { %4355 = vmatprep.subr.mxu0 %v4568_v24 }
 0xad7   :  { %v2914_v41 = vpop.permute.xlu0 %2913  ;;  %4348 = vmatmul.mubr.msk.f32.vlgmr.msra.gmra.mxu0 %vm255_vm9, %v2403_v37  ;;  %v2570_v42 = vpop.permute.xlu1 %2569 }
 0xad8   :  { %4356 = vmatpush3.xpose.msk.msra.mxu0 %vm255_vm9, %v2570_v42  ;;  %4357 = vmatprep.mubr.msk.f32.mxu0 %vm4569_vm8, %v4568_v24 }
 0xad9   :  { %4365 = vmatprep.subr.mxu0 %v4568_v24 }
 0xadb   :  { %v3079_v43 = vpop.permute.xlu0 %3078  ;;  %4358 = vmatmul.mubr.msk.f32.vlgmr.msra.gmra.mxu0 %vm255_vm9, %v2568_v39  ;;  %v2749_v44 = vpop.permute.xlu1 %2748 }
 0xadc   :  { %4366 = vmatpush3.xpose.msk.msra.mxu0 %vm255_vm9, %v2749_v44  ;;  %4367 = vmatprep.mubr.msk.f32.mxu0 %vm4569_vm8, %v4568_v24 }
 0xadd   :  { %4375 = vmatprep.subr.mxu0 %v4568_v24 }
 0xadf   :  { %v3244_v46 = vpop.permute.xlu0 %3243  ;;  %4368 = vmatmul.mubr.msk.f32.vlgmr.msra.gmra.mxu0 %vm255_vm9, %v5085_v34  ;;  %v2912_v47 = vpop.permute.xlu1 %2911 }
 0xae0   :  { %4376 = vmatpush3.xpose.msk.msra.mxu0 %vm255_vm9, %v2914_v41  ;;  %4377 = vmatprep.mubr.msk.f32.mxu0 %vm4569_vm8, %v4568_v24 }
 0xae1   :  { %4385 = vmatprep.subr.mxu0 %v4568_v24 }
 0xae3   :  { %v2162_v48 = vpop.permute.xlu0 %2161  ;;  %4378 = vmatmul.mubr.msk.f32.vlgmr.msra.gmra.mxu0 %vm255_vm9, %v2912_v47  ;;  %v3077_v49 = vpop.permute.xlu1 %3076 }
 0xae4   :  { %4331 = vmatpush3.msra.mxu1 %v2162_v48  ;;  %4386 = vmatpush3.xpose.msk.msra.mxu0 %vm255_vm9, %v3079_v43 }
 0xae5   :  { %4387 = vmatprep.mubr.msk.f32.mxu0 %vm4569_vm8, %v4568_v24  ;;  %4395 = vmatprep.subr.mxu0 %v4568_v24 }
 0xae6   :  { %4340 = vmatprep.subr.mxu1 %v4568_v24 }
 0xae7   :  { %4388 = vmatmul.mubr.msk.f32.vlgmr.msra.gmra.mxu0 %vm255_vm9, %v3077_v49  ;;  %v3242_v50 = vpop.permute.xlu1 %3241 }
 0xae8   :  { %4396 = vmatpush3.xpose.msk.msra.mxu0 %vm255_vm9, %v3244_v46  ;;  %4397 = vmatprep.mubr.msk.f32.mxu0 %vm4569_vm8, %v4568_v24 }
 0xaeb   :  { %4398 = vmatmul.mubr.msk.f32.vlgmr.msra.gmra.mxu0 %vm255_vm9, %v3242_v50  ;;  %v5167_v16 = vpop.permute.xlu1 %2326 }
 0xb8f   :  { %v2146_v51 = vpop.f32.mrf.mxu1 }
 0xb90   :  { %v2147_v52 = vadd.f32 %v2146_v51, %v4860_v45  ;;  %v2311_v53 = vpop.f32.mrf.mxu0 }
 0xb91   :  { %v2312_v54 = vadd.f32 %v2311_v53, %v4860_v45  ;;  %v4329_v55 = vpop.f32.mrf.mxu1 }
 0xb92   :  { %v4339_v56 = vpop.f32.mrf.mxu0  ;;  %v2150_v57 = vsel %vm255_vm9, %v2147_v52, -inf }
 0xb93   :  { %2151 = vmax.xlane.f32.xlu0 %v2150_v57  ;;  %v2315_v58 = vsel %vm255_vm9, %v2312_v54, -inf }
 0xb94   :  { %2316 = vmax.xlane.f32.xlu1 %v2315_v58 }
 0xb97   :  { %v2476_v59 = vpop.f32.mrf.mxu0 }
 0xb98   :  { %v2477_v60 = vadd.f32 %v2476_v59, %v4860_v45 }
 0xb99   :  { %v4349_v61 = vpop.f32.mrf.mxu0 }
 0xb9a   :  { %v2480_v62 = vsel %vm255_vm9, %v2477_v60, -inf }
 0xb9b   :  { %2481 = vmax.xlane.f32.xlu0 %v2480_v62  ;;  %v2641_v63 = vpop.f32.mrf.mxu0 }
 0xb9c   :  { %v2642_v0 = vadd.f32 %v2641_v63, %v4860_v45 }
 0xb9d   :  { %v4359_v1 = vpop.f32.mrf.mxu0 }
 0xb9e   :  { %v2645_v2 = vsel %vm255_vm9, %v2642_v0, -inf }
 0xb9f   :  { %2646 = vmax.xlane.f32.xlu0 %v2645_v2  ;;  %v2820_v3 = vpop.f32.mrf.mxu0 }
 0xba0   :  { %v2821_v4 = vadd.f32 %v2820_v3, %v4860_v45 }
 0xba1   :  { %v4369_v29 = vpop.f32.mrf.mxu0 }
 0xba2   :  { %v2824_v5 = vsel %vm255_vm9, %v2821_v4, -inf }
 0xba3   :  { %2825 = vmax.xlane.f32.xlu1 %v2824_v5  ;;  %v2985_v6 = vpop.f32.mrf.mxu0 }
 0xba4   :  { %v2986_v7 = vadd.f32 %v2985_v6, %v4860_v45 }
 0xba5   :  { %v4379_v8 = vpop.f32.mrf.mxu0 }
 0xba6   :  { %v2989_v9 = vsel %vm255_vm9, %v2986_v7, -inf }
 0xba7   :  { %2990 = vmax.xlane.f32.xlu0 %v2989_v9  ;;  %v3150_v10 = vpop.f32.mrf.mxu0 }
 0xba8   :  { %v3151_v11 = vadd.f32 %v3150_v10, %v4860_v45 }
 0xba9   :  { %v4389_v12 = vpop.f32.mrf.mxu0 }
 0xbaa   :  { %v3154_v13 = vsel %vm255_vm9, %v3151_v11, -inf }
 0xbab   :  { %3155 = vmax.xlane.f32.xlu1 %v3154_v13  ;;  %v3315_v14 = vpop.f32.mrf.mxu0 }
 0xbac   :  { %v3316_v23 = vadd.f32 %v3315_v14, %v4860_v45 }
 0xbad   :  { %v4399_v19 = vpop.f32.mrf.mxu0 }
 0xbae   :  { %v3319_v15 = vsel %vm255_vm9, %v3316_v23, -inf }
 0xbaf   :  { %3320 = vmax.xlane.f32.xlu0 %v3319_v15 }
 0xbbc   :  { %2656 = vrot.lane.b32.xlu1 %v5071_v33, %s5372_s29 }
 0xbc5   :  { %2491 = vrot.lane.b32.xlu0 %v5071_v33, %s5373_s30 }
 0xc1c   :  { %v2152_v17 = vpop.xlane.xlu0 %2151 }
 0xc1d   :  { %v2153_v18 = vsub.f32 %v2147_v52, %v2152_v17  ;;  %v2317_v20 = vpop.xlane.xlu1 %2316 }
 0xc1e   :  { %v2318_v21 = vsub.f32 %v2312_v54, %v2317_v20 }
 0xc1f   :  { %v2154_v22 = vmul.f32 1.442695, %v2153_v18 }
 0xc20   :  { %v2319_v25 = vmul.f32 1.442695, %v2318_v21 }
 0xc21   :  { %4506 = vpow2.f32 %v2154_v22 }
 0xc22   :  { %4508 = vpow2.f32 %v2319_v25 }
 0xc24   :  { %v2482_v45 = vpop.xlane.xlu0 %2481 }
 0xc25   :  { %v2483_v26 = vsub.f32 %v2477_v60, %v2482_v45 }
 0xc27   :  { %v2484_v31 = vmul.f32 1.442695, %v2483_v26 }
 0xc28   :  { %v2647_v32 = vpop.xlane.xlu0 %2646 }
 0xc29   :  { %4510 = vpow2.f32 %v2484_v31  ;;  %v2648_v28 = vsub.f32 %v2642_v0, %v2647_v32 }
 0xc2b   :  { %v2649_v35 = vmul.f32 1.442695, %v2648_v28 }
 0xc2c   :  { %v2826_v43 = vpop.xlane.xlu1 %2825 }
 0xc2d   :  { %4512 = vpow2.f32 %v2649_v35  ;;  %v2827_v44 = vsub.f32 %v2821_v4, %v2826_v43 }
 0xc2e   :  { %v4507_v36 = vpop.eup %4506 }
 0xc2f   :  { %v4509_v33 = vpop.eup %4508  ;;  %v2156_v37 = vsel %vm255_vm9, %v4507_v36, 0.0  ;;  %v2828_v49 = vmul.f32 1.442695, %v2827_v44 }
 0xc30   :  { %2157 = vadd.xlane.f32.xlu1 %v2156_v37  ;;  %v2321_v38 = vsel %vm255_vm9, %v4509_v33, 0.0  ;;  %v2991_v46 = vpop.xlane.xlu0 %2990 }
 0xc31   :  { %2322 = vadd.xlane.f32.xlu0 %v2321_v38  ;;  %v2992_v48 = vsub.f32 %v2986_v7, %v2991_v46  ;;  %4514 = vpow2.f32 %v2828_v49 }
 0xc33   :  { %v2993_v52 = vmul.f32 1.442695, %v2992_v48 }
 0xc34   :  { %v3156_v47 = vpop.xlane.xlu1 %3155 }
 0xc35   :  { %v3157_v50 = vsub.f32 %v3151_v11, %v3156_v47  ;;  %4516 = vpow2.f32 %v2993_v52 }
 0xc36   :  { %v4511_v39 = vpop.eup %4510 }
 0xc37   :  { %v2486_v40 = vsel %vm255_vm9, %v4511_v39, 0.0  ;;  %v3158_v53 = vmul.f32 1.442695, %v3157_v50 }
 0xc38   :  { %2487 = vadd.xlane.f32.xlu1 %v2486_v40  ;;  %v3321_v51 = vpop.xlane.xlu0 %3320  ;;  %v2657_v0 = vpop.permute.xlu1 %2656  ;;  %v4028_v40 = vld [vmem:[%s5351_s5 + $0x30] sm:$0xff] }
 0xc39   :  { %v3322_v54 = vsub.f32 %v3316_v23, %v3321_v51  ;;  %4518 = vpow2.f32 %v3158_v53 }
 0xc3a   :  { %v5172_v41 = vpop.eup %4512 }
 0xc3b   :  { %v2651_v42 = vsel %vm255_vm9, %v5172_v41, 0.0  ;;  %v3323_v55 = vmul.f32 1.442695, %v3322_v54 }
 0xc3c   :  { %2652 = vadd.xlane.f32.xlu0 %v2651_v42  ;;  %v2492_v1 = vpop.permute.xlu0 %2491  ;;  %v4026_v42 = vld [vmem:[%s5351_s5 + $0x20] sm:$0xff] }
 0xc3d   :  { %4520 = vpow2.f32 %v3323_v55 }
 0xc3e   :  { %v4515_v56 = vpop.eup %4514 }
 0xc3f   :  { %v2830_v58 = vsel %vm255_vm9, %v4515_v56, 0.0 }
 0xc42   :  { %v5180_v57 = vpop.eup %4516 }
 0xc43   :  { %v2995_v60 = vsel %vm255_vm9, %v5180_v57, 0.0 }
 0xc46   :  { %v5183_v59 = vpop.eup %4518 }
 0xc47   :  { %v3160_v61 = vsel %vm255_vm9, %v5183_v59, 0.0 }
 0xc49   :  { %3000 = vrot.lane.b32.xlu1 %v5085_v34, %s5371_s17 }
 0xc4a   :  { %v5189_v62 = vpop.eup %4520 }
 0xc4b   :  { %v3325_v63 = vsel %vm255_vm9, %v5189_v62, 0.0 }
 0xc52   :  { %2835 = vrot.lane.b32.xlu0 %v5085_v34, %s5370_s4 }
 0xc6d   :  { %2831 = vadd.xlane.f32.xlu1 %v2830_v58 }
 0xc71   :  { %2996 = vadd.xlane.f32.xlu0 %v2995_v60  ;;  %3161 = vadd.xlane.f32.xlu1 %v3160_v61 }
 0xc75   :  { %3326 = vadd.xlane.f32.xlu1 %v3325_v63 }
 0xc86   :  { %3330 = vrot.lane.b32.xlu1 %v5085_v34, %s5372_s29 }
 0xc87   :  { %3165 = vrot.lane.b32.xlu0 %v5085_v34, %s5373_s30 }
 0xcb9   :  { %v2158_v2 = vpop.xlane.xlu1 %2157 }
 0xcba   :  { %4522 = vrcp.f32 %v2158_v2  ;;  %v2323_v3 = vpop.xlane.xlu0 %2322 }
 0xcbb   :  { %4524 = vrcp.f32 %v2323_v3 }
 0xcc1   :  { %v2488_v4 = vpop.xlane.xlu1 %2487 }
 0xcc2   :  { %4526 = vrcp.f32 %v2488_v4 }
 0xcc5   :  { %v2653_v29 = vpop.xlane.xlu0 %2652  ;;  %v3001_v13 = vpop.permute.xlu1 %3000 }
 0xcc6   :  { %4528 = vrcp.f32 %v2653_v29 }
 0xcc7   :  { %v4523_v5 = vpop.eup %4522 }
 0xcc8   :  { %v2160_v6 = vmul.f32 %v4523_v5, %v4507_v36  ;;  %v4525_v7 = vpop.eup %4524 }
 0xcc9   :  { %v2325_v34 = vmul.f32 %v4525_v7, %v4509_v33  ;;  %v2836_v12 = vpop.permute.xlu0 %2835 }
 0xcca   :  { %4333 = vmatmul.mubr.msk.f32.vlgmr.msra.gmra.mxu1 %vm255_vm9, %v2160_v6 }
 0xccb   :  { %4341 = vmatpush3.msra.mxu1 %v5167_v16  ;;  %4342 = vmatprep.mubr.msk.f32.mxu1 %vm4569_vm8, %v4568_v24 }
 0xccc   :  { %4350 = vmatprep.subr.mxu1 %v4568_v24 }
 0xcce   :  { %4343 = vmatmul.mubr.msk.f32.vlgmr.msra.gmra.mxu1 %vm255_vm9, %v2325_v34 }
 0xccf   :  { %v4527_v8 = vpop.eup %4526  ;;  %4351 = vmatpush3.msra.mxu1 %v2492_v1  ;;  %4352 = vmatprep.mubr.msk.f32.mxu1 %vm4569_vm8, %v4568_v24 }
 0xcd0   :  { %4360 = vmatprep.subr.mxu1 %v4568_v24  ;;  %v2490_v9 = vmul.f32 %v4527_v8, %v4511_v39 }
 0xcd2   :  { %4353 = vmatmul.mubr.msk.f32.vlgmr.msra.gmra.mxu1 %vm255_vm9, %v2490_v9 }
 0xcd3   :  { %v4529_v10 = vpop.eup %4528  ;;  %4361 = vmatpush3.msra.mxu1 %v2657_v0  ;;  %4362 = vmatprep.mubr.msk.f32.mxu1 %vm4569_vm8, %v4568_v24  ;;  %v4031_v0 = vld [vmem:[%s5352_s6 + $0x1] ss:$0 sm:$0xff] }
 0xcd4   :  { %4370 = vmatprep.subr.mxu1 %v4568_v24  ;;  %v2655_v11 = vmul.f32 %v4529_v10, %v5172_v41  ;;  %v4027_v41 = vld [vmem:[%s5351_s5 + $0x28] sm:$0xff] }
 0xcd6   :  { %4363 = vmatmul.mubr.msk.f32.vlgmr.msra.gmra.mxu1 %vm255_vm9, %v2655_v11 }
 0xcd7   :  { %4371 = vmatpush3.msra.mxu1 %v2836_v12  ;;  %4372 = vmatprep.mubr.msk.f32.mxu1 %vm4569_vm8, %v4568_v24 }
 0xcd8   :  { %4380 = vmatprep.subr.mxu1 %v4568_v24 }
 0xcf6   :  { %v2832_v14 = vpop.xlane.xlu1 %2831 }
 0xcf7   :  { %4530 = vrcp.f32 %v2832_v14 }
 0xcfa   :  { %v2997_v23 = vpop.xlane.xlu0 %2996  ;;  %v3162_v19 = vpop.xlane.xlu1 %3161 }
 0xcfb   :  { %4532 = vrcp.f32 %v2997_v23 }
 0xcfc   :  { %4534 = vrcp.f32 %v3162_v19  ;;  %v4040_v19 = vld [vmem:[%s5353_s7 + $0x30] sm:$0xff] }
 0xcfe   :  { %v3327_v15 = vpop.xlane.xlu1 %3326  ;;  %v3166_v22 = vpop.permute.xlu0 %3165 }
 0xcff   :  { %4536 = vrcp.f32 %v3327_v15  ;;  %v4039_v15 = vld [vmem:[%s5353_s7 + $0x28] sm:$0xff] }
 0xd02   :  { %v3331_v26 = vpop.permute.xlu1 %3330 }
 0xd04   :  { %v4531_v16 = vpop.eup %4530 }
 0xd05   :  { %v2834_v17 = vmul.f32 %v4531_v16, %v4515_v56  ;;  %v4038_v16 = vld [vmem:[%s5353_s7 + $0x20] sm:$0xff] }
 0xd07   :  { %4373 = vmatmul.mubr.msk.f32.vlgmr.msra.gmra.mxu1 %vm255_vm9, %v2834_v17  ;;  %v4053_v17 = vld [vmem:[%s5355_s9 + $0x78] sm:$0xff] }
 0xd08   :  { %v4533_v18 = vpop.eup %4532  ;;  %4381 = vmatpush3.msra.mxu1 %v3001_v13  ;;  %4382 = vmatprep.mubr.msk.f32.mxu1 %vm4569_vm8, %v4568_v24 }
 0xd09   :  { %4390 = vmatprep.subr.mxu1 %v4568_v24  ;;  %v2999_v20 = vmul.f32 %v4533_v18, %v5180_v57  ;;  %v4535_v21 = vpop.eup %4534  ;;  %v4052_v18 = vld [vmem:[%s5355_s9 + $0x70] sm:$0xff] }
 0xd0a   :  { %v3164_v25 = vmul.f32 %v4535_v21, %v5183_v59  ;;  %v4050_v21 = vld [vmem:[%s5355_s9 + $0x60] sm:$0xff] }
 0xd0b   :  { %4383 = vmatmul.mubr.msk.f32.vlgmr.msra.gmra.mxu1 %vm255_vm9, %v2999_v20  ;;  %v4051_v20 = vld [vmem:[%s5355_s9 + $0x68] sm:$0xff] }
 0xd0c   :  { %4391 = vmatpush3.msra.mxu1 %v3166_v22  ;;  %4392 = vmatprep.mubr.msk.f32.mxu1 %vm4569_vm8, %v4568_v24  ;;  %v4537_v45 = vpop.eup %4536 }
 0xd0d   :  { %4400 = vmatprep.subr.mxu1 %v4568_v24  ;;  %v3329_v31 = vmul.f32 %v4537_v45, %v5189_v62 }
 0xd0f   :  { %4393 = vmatmul.mubr.msk.f32.vlgmr.msra.gmra.mxu1 %vm255_vm9, %v3164_v25 }
 0xd10   :  { %4401 = vmatpush3.msra.mxu1 %v3331_v26  ;;  %4402 = vmatprep.mubr.msk.f32.mxu1 %vm4569_vm8, %v4568_v24  ;;  %v4029_v24 = vld [vmem:[%s5351_s5 + $0x38] sm:$0xff] }
 0xd11   :  { %4405 = vmatprep.subr.mxu0 %v4029_v24 }
 0xd12   :  { %4406 = vmatpush3.msra.mxu0 %v4029_v24 }
 0xd13   :  { %4403 = vmatmul.mubr.msk.f32.vlgmr.msra.gmra.mxu1 %vm255_vm9, %v3329_v31  ;;  %4407 = vmatprep.subr.mxu0 %v4028_v40 }
 0xd14   :  { %4408 = vmatpush3.msra.mxu0 %v4028_v40 }
 0xd15   :  { %4409 = vmatprep.subr.mxu0 %v4027_v41 }
 0xd16   :  { %4410 = vmatpush3.msra.mxu0 %v4027_v41 }
 0xd17   :  { %4411 = vmatprep.subr.mxu0 %v4026_v42 }
 0xd18   :  { %4412 = vmatpush3.msra.mxu0 %v4026_v42  ;;  %v4049_v42 = vld [vmem:[%s5355_s9 + $0x58] sm:$0xff] }
 0xd19   :  { %4427 = vmatprep.subr.mxu0 %v4053_v17 }
 0xd8a   :  { %v2233_v32 = vpop.f32.mrf.mxu1 }
 0xd8c   :  { %v4334_v28 = vpop.f32.mrf.mxu1 }
 0xd8e   :  { %v2398_v35 = vpop.f32.mrf.mxu1 }
 0xd8f   :  { %2733 = vrot.lane.b32.xlu0 %v2398_v35, %s4581_s25  ;;  %v4036_v35 = vld [vmem:[%s5357_s11 + $0x1] ss:$0 sm:$0xff] }
 0xd90   :  { %v4344_v36 = vpop.f32.mrf.mxu1 }
 0xd92   :  { %v2563_v33 = vpop.f32.mrf.mxu1 }
 0xd93   :  { %2737 = vrot.lane.b32.xlu1 %v2563_v33, %s4582_s26  ;;  %v4037_v33 = vld [vmem:[%s5358_s12 + $0x1] ss:$0 sm:$0xff] }
 0xd94   :  { %v4354_v37 = vpop.f32.mrf.mxu1 }
 0xd96   :  { %v2728_v38 = vpop.f32.mrf.mxu1 }
 0xd97   :  { %2741 = vrot.lane.b32.xlu1 %v2728_v38, %s4583_s27 }
 0xd98   :  { %v4364_v39 = vpop.f32.mrf.mxu1 }
 0xdc7   :  { %v2907_v43 = vpop.f32.mrf.mxu1 }
 0xdc9   :  { %v4374_v44 = vpop.f32.mrf.mxu1 }
 0xdca   :  { %v4047_v44 = vld [vmem:[%s5355_s9 + $0x48] sm:$0xff] }
 0xdcb   :  { %v3072_v46 = vpop.f32.mrf.mxu1 }
 0xdcc   :  { %3407 = vrot.lane.b32.xlu0 %v3072_v46, %s4581_s25  ;;  %v4046_v46 = vld [vmem:[%s5355_s9 + $0x40] sm:$0xff] }
 0xdcd   :  { %v4384_v47 = vpop.f32.mrf.mxu1 }
 0xdce   :  { %v4043_v47 = vld [vmem:[%s5354_s8 + $0x1] ss:$0 sm:$0xff] }
 0xdcf   :  { %v3237_v48 = vpop.f32.mrf.mxu1 }
 0xdd0   :  { %3411 = vrot.lane.b32.xlu0 %v3237_v48, %s4582_s26 }
 0xdd1   :  { %v4394_v49 = vpop.f32.mrf.mxu1 }
 0xdd3   :  { %v3402_v50 = vpop.f32.mrf.mxu1 }
 0xdd4   :  { %3415 = vrot.lane.b32.xlu1 %v3402_v50, %s4583_s27 }
 0xdd5   :  { %v4404_v51 = vpop.f32.mrf.mxu1 }
 0xe01   :  { %v2734_v52 = vpop.permute.xlu0 %2733 }
 0xe02   :  { %v2744_v54 = vsel %vm255_vm9, %v2233_v32, %v2734_v52 }
 0xe05   :  { %v2738_v53 = vpop.permute.xlu1 %2737 }
 0xe06   :  { %v2745_v55 = vsel %vm925_vm10, %v2744_v54, %v2738_v53  ;;  %v4055_v54 = vld [vmem:[%s5356_s10 + $0x1] ss:$0 sm:$0xff] }
 0xe09   :  { %v2742_v56 = vpop.permute.xlu1 %2741 }
 0xe0a   :  { %v2746_v57 = vsel %vm927_vm11, %v2745_v55, %v2742_v56 }
 0xe0b   :  { %4413 = vmatprep.mubr.msk.f32.mxu0 %vm172_vm7, %v2746_v57 }
 0xe3e   :  { %v3408_v58 = vpop.permute.xlu0 %3407 }
 0xe3f   :  { %v3418_v60 = vsel %vm255_vm9, %v2907_v43, %v3408_v58  ;;  %v4048_v43 = vld [vmem:[%s5355_s9 + $0x50] sm:$0xff] }
 0xe42   :  { %v3412_v59 = vpop.permute.xlu0 %3411 }
 0xe43   :  { %v3419_v61 = vsel %vm925_vm10, %v3418_v60, %v3412_v59 }
 0xe46   :  { %v3416_v62 = vpop.permute.xlu1 %3415 }
 0xe47   :  { %v3420_v63 = vsel %vm927_vm11, %v3419_v61, %v3416_v62 }
 0xe48   :  { %4414 = vmatmul.mubr.msk.f32.vlgmr.msra.gmra.mxu0 %vm172_vm7, %v3420_v63 }
 0xe49   :  { %4428 = vmatpush3.msra.mxu0 %v4053_v17 }
 0xe4a   :  { %4429 = vmatprep.subr.mxu0 %v4052_v18 }
 0xe4b   :  { %4430 = vmatpush3.msra.mxu0 %v4052_v18  ;;  %v4061_v18 = vld [vmem:[%s5360_s14 + $0x1] ss:$0 sm:$0xff] }
 0xe4c   :  { %4431 = vmatprep.subr.mxu0 %v4051_v20 }
 0xe4d   :  { %4432 = vmatpush3.msra.mxu0 %v4051_v20 }
 0xe4e   :  { %4433 = vmatprep.subr.mxu0 %v4050_v21 }
 0xe4f   :  { %4434 = vmatpush3.msra.mxu0 %v4050_v21 }
 0xe50   :  { %4435 = vmatprep.subr.mxu0 %v4049_v42 }
 0xe51   :  { %4436 = vmatpush3.msra.mxu0 %v4049_v42 }
 0xe52   :  { %4437 = vmatprep.subr.mxu0 %v4048_v43 }
 0xe53   :  { %4438 = vmatpush3.msra.mxu0 %v4048_v43 }
 0xe54   :  { %4439 = vmatprep.subr.mxu0 %v4047_v44 }
 0xe55   :  { %4440 = vmatpush3.msra.mxu0 %v4047_v44 }
 0xe56   :  { %4441 = vmatprep.subr.mxu0 %v4046_v46 }
 0xe57   :  { %4442 = vmatpush3.msra.mxu0 %v4046_v46 }
 0xf08   :  { %v4415_v1 = vpop.f32.mrf.mxu0 }
 0xf09   :  { %v3512_v2 = vadd.f32 %v4415_v1, %v4031_v0 }
 0xf0a   :  { %v3506_v3 = vpop.f32.mrf.mxu0 }
 0xf0b   :  { %v3507_v4 = vadd.f32 %v4031_v0, %v3506_v3  ;;  %v3516_v29 = vadd.f32 %v3512_v2, %v5060_v30 }
 0xf0d   :  { %v3524_v5 = vsel %vm172_vm7, %v3516_v29, 0.0  ;;  %v3515_v6 = vadd.f32 %v3507_v4, %v5058_v27  ;;  %v4041_v27 = vld [vmem:[%s5353_s7 + $0x38] sm:$0xff] }
 0xf0e   :  { %3525 = vadd.xlane.f32.xlu1 %v3524_v5  ;;  %4416 = vmatprep.subr.mxu1 %v4041_v27 }
 0xf0f   :  { %v3521_v7 = vsel %vm172_vm7, %v3515_v6, 0.0  ;;  %4417 = vmatpush3.msra.mxu1 %v4041_v27 }
 0xf10   :  { %3522 = vadd.xlane.f32.xlu0 %v3521_v7  ;;  %4418 = vmatprep.subr.mxu1 %v4040_v19 }
 0xf11   :  { %4419 = vmatpush3.msra.mxu1 %v4040_v19 }
 0xf12   :  { %4420 = vmatprep.subr.mxu1 %v4039_v15 }
 0xf13   :  { %4421 = vmatpush3.msra.mxu1 %v4039_v15  ;;  %v4060_v15 = vld [vmem:[%s5359_s13 + $0x1] ss:$0 sm:$0xff]  ;;  %s4585_s13 = smov [#allocation2]  }
 0xf14   :  { %4422 = vmatprep.subr.mxu1 %v4038_v16  ;;  %s3943_s14 = sshll.u32 %s4585_s13, 4  ;;  %s3944_s14 = int_to_ptr.vmem [resolvable:$true] %s3943_s14 }
 0xf15   :  { %4423 = vmatpush3.msra.mxu1 %v4038_v16  ;;  %s4546_s4 = scalar_lea.vmem %s3944_s14, 256  ;;  %p4551_p1 = scmp.lt.s32.totalorder %s3944_s14, %s3944_s14 }
 0xf16   :  { %p4547_p0 = scmp.ne.s32.totalorder %s3944_s14, %s4546_s4  ;;  %p4552_p2 = scmp.lt.s32.totalorder %s4546_s4, %s4546_s4 }
 0xf18   :  { %p4553_p3 = por %p4552_p2, %p4551_p1 }
 0xf1a   :  { %p4554_p4 = pnand %p4553_p3, %p4547_p0 }
 0xf97   :  { %v3526_v34 = vpop.xlane.xlu1 %3525 }
 0xf98   :  { %v3528_v8 = vmul.f32 0.03125, %v3526_v34 }
 0xf99   :  { %v3523_v9 = vpop.xlane.xlu0 %3522 }
 0xf9a   :  { %v3527_v10 = vmul.f32 0.03125, %v3523_v9  ;;  %v3530_v11 = vsub.f32 %v3516_v29, %v3528_v8 }
 0xf9c   :  { %v3529_v12 = vsub.f32 %v3515_v6, %v3527_v10  ;;  %v3532_v23 = vmul.f32 %v3530_v11, %v3530_v11 }
 0xf9e   :  { %v3531_v13 = vmul.f32 %v3529_v12, %v3529_v12  ;;  %v3536_v30 = vsel %vm172_vm7, %v3532_v23, 0.0  ;;  %v3810_v23 = vlaneseq }
 0xfa0   :  { %v3533_v14 = vsel %vm172_vm7, %v3531_v13, 0.0  ;;  %v4584_v13 = vmov 1966171168   ;;  %v3811_v27 = vshrl.u32 %v3810_v23, 7 }
 0xfa1   :  { %3534 = vadd.xlane.f32.xlu0 %v3533_v14  ;;  %v3808_v14 = vunpack.c.l.s4 %v4584_v13 }
 0xfa5   :  { %3537 = vadd.xlane.f32.xlu0 %v3536_v30  ;;  %v3809_v30 = vunpack.c.0.s8 %v3808_v14 }
 0xfa7   :  { %v3812_v20 = vsub.s32 %v3809_v30, %v3811_v27 }
0x102a   :  { %v3535_v22 = vpop.xlane.xlu0 %3534 }
0x102b   :  { %v3539_v25 = vmul.f32 0.03125, %v3535_v22 }
0x102d   :  { %v3541_v45 = vadd.f32 1e-05, %v3539_v25 }
0x102e   :  { %v3538_v26 = vpop.xlane.xlu0 %3537 }
0x102f   :  { %4538 = vrsqrt.f32 %v3541_v45  ;;  %v3540_v31 = vmul.f32 0.03125, %v3538_v26 }
0x1031   :  { %v3542_v32 = vadd.f32 1e-05, %v3540_v31 }
0x1033   :  { %4540 = vrsqrt.f32 %v3542_v32 }
0x103c   :  { %v4539_v28 = vpop.eup %4538 }
0x103d   :  { %v3545_v36 = vmul.f32 %v4539_v28, %v3529_v12 }
0x103f   :  { %v3553_v37 = vmul.f32 %v4036_v35, %v3545_v36 }
0x1040   :  { %v4541_v38 = vpop.eup %4540 }
0x1041   :  { %v3546_v39 = vmul.f32 %v4541_v38, %v3530_v11  ;;  %v3561_v24 = vadd.f32 %v4037_v33, %v3553_v37 }
0x1043   :  { %v3554_v40 = vmul.f32 %v4036_v35, %v3546_v39  ;;  %4424 = vmatprep.mubr.msk.f32.mxu1 %vm172_vm7, %v3561_v24 }
0x1045   :  { %v3562_v41 = vadd.f32 %v4037_v33, %v3554_v40 }
0x1047   :  { %4425 = vmatmul.mubr.msk.f32.vlgmr.msra.gmra.mxu1 %vm172_vm7, %v3562_v41 }
0x1107   :  { %v4426_v48 = vpop.f32.mrf.mxu1 }
0x1108   :  { %v3654_v49 = vadd.f32 %v4426_v48, %v4043_v47 }
0x1109   :  { %v3648_v50 = vpop.f32.mrf.mxu1 }
0x110a   :  { %v3649_v51 = vadd.f32 %v4043_v47, %v3648_v50  ;;  %v3658_v53 = vmax.f32 %v3654_v49, 0.0 }
0x110c   :  { %v3657_v52 = vmax.f32 %v3649_v51, 0.0 }
0x110e   :  { %4443 = vmatprep.mubr.msk.f32.mxu0 %vm1851_vm12, %v3657_v52 }
0x110f   :  { %4444 = vmatmul.mubr.msk.f32.vlgmr.msra.gmra.mxu0 %vm1851_vm12, %v3658_v53 }
0x11cf   :  { %v4445_v55 = vpop.f32.mrf.mxu0 }
0x11d0   :  { %v3754_v56 = vadd.f32 %v4445_v55, %v4055_v54 }
0x11d1   :  { %v3748_v57 = vpop.f32.mrf.mxu0 }
0x11d2   :  { %v3758_v58 = vadd.f32 %v3754_v56, %v3562_v41  ;;  %v3749_v59 = vadd.f32 %v4055_v54, %v3748_v57 }
0x11d4   :  { %v3757_v60 = vadd.f32 %v3749_v59, %v3561_v24  ;;  %v3766_v61 = vsel %vm172_vm7, %v3758_v58, 0.0 }
0x11d5   :  { %3767 = vadd.xlane.f32.xlu0 %v3766_v61 }
0x11d6   :  { %v3763_v62 = vsel %vm172_vm7, %v3757_v60, 0.0 }
0x11d7   :  { %3764 = vadd.xlane.f32.xlu1 %v3763_v62 }
0x125e   :  { %v3768_v63 = vpop.xlane.xlu0 %3767 }
0x125f   :  { %v3770_v0 = vmul.f32 0.03125, %v3768_v63 }
0x1260   :  { %v3765_v1 = vpop.xlane.xlu1 %3764 }
0x1261   :  { %v3772_v2 = vsub.f32 %v3758_v58, %v3770_v0  ;;  %v3769_v3 = vmul.f32 0.03125, %v3765_v1 }
0x1263   :  { %v3771_v4 = vsub.f32 %v3757_v60, %v3769_v3  ;;  %v3774_v29 = vmul.f32 %v3772_v2, %v3772_v2 }
0x1265   :  { %v3778_v5 = vsel %vm172_vm7, %v3774_v29, 0.0  ;;  %v3773_v6 = vmul.f32 %v3771_v4, %v3771_v4 }
0x1266   :  { %3779 = vadd.xlane.f32.xlu0 %v3778_v5 }
0x1267   :  { %v3775_v7 = vsel %vm172_vm7, %v3773_v6, 0.0 }
0x1268   :  { %3776 = vadd.xlane.f32.xlu1 %v3775_v7 }
0x12ef   :  { %v3780_v34 = vpop.xlane.xlu0 %3779 }
0x12f0   :  { %v3782_v8 = vmul.f32 0.03125, %v3780_v34 }
0x12f1   :  { %v3777_v9 = vpop.xlane.xlu1 %3776 }
0x12f2   :  { %v3784_v10 = vadd.f32 1e-05, %v3782_v8  ;;  %v3781_v11 = vmul.f32 0.03125, %v3777_v9 }
0x12f4   :  { %4542 = vrsqrt.f32 %v3784_v10  ;;  %v3783_v12 = vadd.f32 1e-05, %v3781_v11 }
0x12f6   :  { %4544 = vrsqrt.f32 %v3783_v12 }
0x1301   :  { %v4543_v19 = vpop.eup %4542 }
0x1302   :  { %v3788_v16 = vmul.f32 %v4543_v19, %v3772_v2 }
0x1303   :  { %v4545_v17 = vpop.eup %4544 }
0x1304   :  { %v3796_v21 = vmul.f32 %v4060_v15, %v3788_v16  ;;  %v3787_v22 = vmul.f32 %v4545_v17, %v3771_v4 }
0x1306   :  { %v3804_v25 = vadd.f32 %v4061_v18, %v3796_v21  ;;  %v3795_v45 = vmul.f32 %v4060_v15, %v3787_v22 }
0x1308   :  { %v3873_v26 = vcombine.high %v3804_v25, %v3804_v25  ;;  %v3880_v31 = vrot.slane %v3804_v25, %v3812_v20  ;;  %v3803_v32 = vadd.f32 %v4061_v18, %v3795_v45 }
0x130a   :  { %v3887_v28 = vrot.slane %v3873_v26, %v3812_v20  ;;  %v3888_v35 = vcombine.high %v3880_v31, %v3880_v31  ;;  %v3896_v36 = vrot.slane %v3880_v31, %v3812_v20  ;;  %v3806_v33 = vcombine.high %v3803_v32, %v3803_v32 }
0x130b   :  { %v3813_v37 = vrot.slane %v3803_v32, %v3812_v20 }
0x130c   :  { %v3889_v38 = vcombine.high %v3887_v28, %v3887_v28  ;;  %v3903_v39 = vrot.slane %v3887_v28, %v3812_v20  ;;  %v3910_v24 = vrot.slane %v3888_v35, %v3812_v20  ;;  %v3918_v40 = vcombine.high %v3896_v36, %v3896_v36  ;;  %3930 = vst.msk [vmem:[#allocation2 + $0x1] sm:$0x1] %vm3863_vm13, %v3896_v36 }
0x130d   :  { %v3820_v41 = vrot.slane %v3806_v33, %v3812_v20  ;;  %v3821_v42 = vcombine.high %v3813_v37, %v3813_v37  ;;  %v3829_v43 = vrot.slane %v3813_v37, %v3812_v20 }
0x130e   :  { %v3917_v44 = vrot.slane %v3889_v38, %v3812_v20  ;;  %v3919_v46 = vcombine.high %v3903_v39, %v3903_v39  ;;  %v3920_v47 = vcombine.high %v3910_v24, %v3910_v24  ;;  %3931 = vst.msk [vmem:[#allocation2 + $0x3] sm:$0x1] %vm3863_vm13, %v3910_v24  ;;  %3932 = vst.msk [vmem:[#allocation2 + $0x5] sm:$0x1] %vm3863_vm13, %v3918_v40 }
0x130f   :  { %3934 = vst.msk [vmem:[#allocation2 + $0x9] sm:$0x1] %vm3863_vm13, %v3903_v39  ;;  %v3822_v48 = vcombine.high %v3820_v41, %v3820_v41  ;;  %v3836_v49 = vrot.slane %v3820_v41, %v3812_v20  ;;  %v3843_v50 = vrot.slane %v3821_v42, %v3812_v20  ;;  %v3851_v51 = vcombine.high %v3829_v43, %v3829_v43 }
0x1310   :  { %3864 = vst.msk [vmem:[#allocation2] sm:$0x1] %vm3863_vm13, %v3829_v43  ;;  %v3921_v52 = vcombine.high %v3917_v44, %v3917_v44  ;;  %3933 = vst.msk [vmem:[#allocation2 + $0x7] sm:$0x1] %vm3863_vm13, %v3920_v47 }
0x1311   :  { %3935 = vst.msk [vmem:[#allocation2 + $0xb] sm:$0x1] %vm3863_vm13, %v3917_v44  ;;  %3936 = vst.msk [vmem:[#allocation2 + $0xd] sm:$0x1] %vm3863_vm13, %v3919_v46  ;;  %v3850_v53 = vrot.slane %v3822_v48, %v3812_v20  ;;  %v3852_v54 = vcombine.high %v3836_v49, %v3836_v49  ;;  %v3853_v55 = vcombine.high %v3843_v50, %v3843_v50 }
0x1312   :  { %3865 = vst.msk [vmem:[#allocation2 + $0x2] sm:$0x1] %vm3863_vm13, %v3843_v50  ;;  %3866 = vst.msk [vmem:[#allocation2 + $0x4] sm:$0x1] %vm3863_vm13, %v3851_v51 }
0x1313   :  { %3868 = vst.msk [vmem:[#allocation2 + $0x8] sm:$0x1] %vm3863_vm13, %v3836_v49  ;;  %3937 = vst.msk [vmem:[#allocation2 + $0xf] sm:$0x1] %vm3863_vm13, %v3921_v52  ;;  %v3854_v56 = vcombine.high %v3850_v53, %v3850_v53 }
0x1314   :  { %3867 = vst.msk [vmem:[#allocation2 + $0x6] sm:$0x1] %vm3863_vm13, %v3853_v55  ;;  %3869 = vst.msk [vmem:[#allocation2 + $0xa] sm:$0x1] %vm3863_vm13, %v3850_v53 }
0x1315   :  { %3870 = vst.msk [vmem:[#allocation2 + $0xc] sm:$0x1] %vm3863_vm13, %v3852_v54  ;;  %3871 = vst.msk [vmem:[#allocation2 + $0xe] sm:$0x1] %vm3863_vm13, %v3854_v56 }
0x1316   :  { %4557 = shalt.err (!%p4554_p4)
}
0x1317   :  { %s4586_s17 = smov 32   ;;  %s4587_s29 = smov 2  }
0x1318   :  { %3949 = dma.vmem_to_hbm [thread:$0]  %s3944_s14, 256, %s5361_s15, [#allocation3], %s4586_s17, %s4586_s17, %s4587_s29  }
0x1319   :  { %4566 = dma.done.wait [#allocation3], 256  }
0x131a   :  { %4567 = vsyncadd [#allocation3], 4294967040 }
0x131b   :  { %3953 = vsyncpa [#allocation3], 1 }

</bundles_post_ra>
